<compile_context>
chip_gen: v5e
topology: v5e:2x2
jax: 0.10.0
libtpu: 0.0.40
codegen_flags: <defaults>
</compile_context>

<pallas_src>
import functools

import jax
import jax.numpy as jnp
from jax.experimental import pallas as pl
from jax.experimental.pallas import tpu as pltpu


# --------------------------------------------------------------------------
# Fused per-sample kernel
# --------------------------------------------------------------------------
def _unet_kernel(x_ref, w1_ref, b1_ref, w2_ref, b2_ref, w3a_ref, w3b_ref,
                 b3_ref, w4_ref, b4_ref, g_ref, beta_ref, o_ref,
                 *, H, W, eps, use_ln, use_sigmoid):
    """Whole forward for one sample, VMEM resident, spatial H*W on lanes."""
    HW = H * W
    f32 = jnp.float32

    lane = jax.lax.broadcasted_iota(jnp.int32, (1, HW), 1)   # flat index p = i*W + j
    col = jnp.bitwise_and(lane, W - 1)                       # j  (W is a power of 2)

    def shift(v, k):
        """y[c, p] = v[c, p + k], zero filled out of range (lane shift)."""
        if k == 0:
            return v
        c = v.shape[0]
        z = jnp.zeros((c, abs(k)), f32)
        if k > 0:
            return jnp.concatenate([v[:, k:], z], axis=1)
        return jnp.concatenate([z, v[:, :HW + k]], axis=1)

    def conv3x3(v, w_r, dil):
        """'same' 3x3 conv (optionally dilated) as one im2col matmul.

        v: (Cin, HW); w_r: (Cout, 9*Cin) with rows ordered (dy, dx, cin).
        Row out-of-bounds taps are zeroed by the shift fill; column
        out-of-bounds taps are masked with the flat column index.
        """
        taps = []
        for dy in (-1, 0, 1):
            for dx in (-1, 0, 1):
                s = shift(v, dil * (dy * W + dx))
                if dx != 0:
                    valid = (col + dil * dx >= 0) & (col + dil * dx < W)
                    s = jnp.where(valid, s, 0.0)
                taps.append(s)
        patches = jnp.concatenate(taps, axis=0)              # (9*Cin, HW)
        return jnp.dot(w_r, patches, preferred_element_type=f32)

    x = x_ref[0].astype(f32)                                  # (Cin, HW)

    # --- encoder: conv1 (3x3, same) + ReLU --------------------------------
    e1 = jnp.maximum(conv3x3(x, w1_ref[...], 1) + b1_ref[...], 0.0)     # (c1, HW)

    # --- 2x2 / stride-2 max pool, kept un-decimated ------------------------
    # pool[c, i*W + j] == max over the 2x2 window containing (i, j), i.e. the
    # pooled value replicated over its window (= nearest upsample for free).
    odd_row = jnp.bitwise_and(lane, W) != 0                   # bit0 of row i
    rm = jnp.maximum(e1, jnp.where(odd_row, shift(e1, -W), shift(e1, W)))
    odd_col = jnp.bitwise_and(lane, 1) != 0                   # bit0 of col j
    pool = jnp.maximum(rm, jnp.where(odd_col, shift(rm, -1), shift(rm, 1)))

    # --- conv2 (3x3 on the H/2 x W/2 grid) + ReLU --------------------------
    # On the un-decimated representation this is exactly a dilation-2 conv and
    # its output is already the nearest-neighbour-upsampled decoder input u1.
    u1 = jnp.maximum(conv3x3(pool, w2_ref[...], 2) + b2_ref[...], 0.0)  # (c2, HW)

    # --- decoder conv3 over concat([u1, e1]) + ReLU ------------------------
    # Channel concat folded into two matmuls accumulating into one value.
    d1 = jnp.maximum(conv3x3(u1, w3a_ref[...], 1)
                     + conv3x3(e1, w3b_ref[...], 1)
                     + b3_ref[...], 0.0)                      # (c1, HW)

    # --- 1x1 segmentation head -> 3 classes --------------------------------
    seg = jnp.dot(w4_ref[...], d1, preferred_element_type=f32) + b4_ref[...]

    # --- LayerNorm([3, H, W]) + Sigmoid ------------------------------------
    y = seg
    if use_ln:
        n = seg.size
        mean = jnp.sum(seg) / n
        xc = seg - mean
        var = jnp.sum(xc * xc) / n
        y = xc * jax.lax.rsqrt(var + eps)
        y = y * g_ref[...] + beta_ref[...]
    if use_sigmoid:
        y = 1.0 / (1.0 + jnp.exp(-y))
    o_ref[0] = y.astype(o_ref.dtype)                          # (3, HW) lane-dense


# --------------------------------------------------------------------------
# Wrapper: weight re-layout + single pallas_call
# --------------------------------------------------------------------------
def unet_forward(x_nchw, params, *, layernorm=True, activation="sigmoid"):
    assert activation in (None, "sigmoid")
    N, Cin, H, W = x_nchw.shape
    # bit tricks in the kernel need power-of-two W and even H, W
    assert (W & (W - 1)) == 0 and H % 2 == 0 and W % 2 == 0
    HW = H * W
    c1 = params["w1"].shape[-1]
    c2 = params["w2"].shape[-1]
    classes = params["w4"].shape[-1]

    def prep_w(w):                       # (K, K, Cin, Cout) -> (Cout, K*K*Cin)
        kk = w.shape[0] * w.shape[1] * w.shape[2]
        return w.reshape(kk, w.shape[3]).T

    w1_r = prep_w(params["w1"])
    w2_r = prep_w(params["w2"])
    w3a_r = prep_w(params["w3"][:, :, :c2, :])    # taps applied to u1 (first c2 ch)
    w3b_r = prep_w(params["w3"][:, :, c2:, :])    # taps applied to e1 (skip)
    w4_r = prep_w(params["w4"])                   # (classes, c1)
    b1 = params["b1"].reshape(c1, 1)
    b2 = params["b2"].reshape(c2, 1)
    b3 = params["b3"].reshape(c1, 1)
    b4 = params["b4"].reshape(classes, 1)
    gamma = params["gamma"].reshape(classes, HW)
    beta = params["beta"].reshape(classes, HW)
    x_flat = x_nchw.reshape(N, Cin, HW)           # spatial on lanes

    kern = functools.partial(_unet_kernel, H=H, W=W, eps=1e-5,
                             use_ln=layernorm,
                             use_sigmoid=(activation == "sigmoid"))

    def full2d(a):
        return pl.BlockSpec(a.shape, lambda n: (0, 0))

    out = pl.pallas_call(
        kern,
        out_shape=jax.ShapeDtypeStruct((N, classes, HW), x_nchw.dtype),
        grid=(N,),
        in_specs=[
            pl.BlockSpec((1, Cin, HW), lambda n: (n, 0, 0)),
            full2d(w1_r), full2d(b1),
            full2d(w2_r), full2d(b2),
            full2d(w3a_r), full2d(w3b_r), full2d(b3),
            full2d(w4_r), full2d(b4),
            full2d(gamma), full2d(beta),
        ],
        out_specs=pl.BlockSpec((1, classes, HW), lambda n: (n, 0, 0)),
        compiler_params=pltpu.CompilerParams(
            dimension_semantics=("parallel",)),
    )(x_flat, w1_r, b1, w2_r, b2, w3a_r, w3b_r, b3, w4_r, b4, gamma, beta)
    return out.reshape(N, classes, H, W)


# --------------------------------------------------------------------------
# Parameters
# --------------------------------------------------------------------------
def init_params(key, in_channels=4, img=(16, 16), c1=8, c2=16, classes=3):
    H, W = img
    keys = jax.random.split(key, 6)

    def conv_w(k, K, cin, cout):
        fan_in = K * K * cin
        return (jax.random.normal(k, (K, K, cin, cout), jnp.float32)
                / jnp.sqrt(jnp.float32(fan_in)))

    return dict(
        w1=conv_w(keys[0], 3, in_channels, c1), b1=jnp.zeros((c1,), jnp.float32),
        w2=conv_w(keys[1], 3, c1, c2),          b2=jnp.zeros((c2,), jnp.float32),
        w3=conv_w(keys[2], 3, c2 + c1, c1),     b3=jnp.zeros((c1,), jnp.float32),
        w4=conv_w(keys[3], 1, c1, classes),     b4=jnp.zeros((classes,), jnp.float32),
        gamma=1.0 + 0.1 * jax.random.normal(keys[4], (classes, H, W), jnp.float32),
        beta=0.1 * jax.random.normal(keys[5], (classes, H, W), jnp.float32),
    )


# --------------------------------------------------------------------------
# Pure-JAX reference (for correctness check only)
# --------------------------------------------------------------------------
def unet_reference(x, p, *, layernorm=True, activation="sigmoid"):
    dn = ("NCHW", "HWIO", "NCHW")

    def conv(v, w, b, relu):
        y = jax.lax.conv_general_dilated(
            v, w, (1, 1), "SAME", dimension_numbers=dn,
            precision=jax.lax.Precision.HIGHEST)
        y = y + b.reshape(1, -1, 1, 1)
        return jnp.maximum(y, 0.0) if relu else y

    e1 = conv(x, p["w1"], p["b1"], True)
    p1 = jax.lax.reduce_window(e1, -jnp.inf, jax.lax.max,
                               (1, 1, 2, 2), (1, 1, 2, 2), "VALID")
    e2 = conv(p1, p["w2"], p["b2"], True)
    u1 = jnp.repeat(jnp.repeat(e2, 2, axis=2), 2, axis=3)
    cat = jnp.concatenate([u1, e1], axis=1)
    d1 = conv(cat, p["w3"], p["b3"], True)
    seg = conv(d1, p["w4"], p["b4"], False)
    y = seg
    if layernorm:
        mean = jnp.mean(seg, axis=(1, 2, 3), keepdims=True)
        var = jnp.var(seg, axis=(1, 2, 3), keepdims=True)
        y = (seg - mean) * jax.lax.rsqrt(var + 1e-5)
        y = y * p["gamma"][None] + p["beta"][None]
    if activation == "sigmoid":
        y = jax.nn.sigmoid(y)
    return y


# --------------------------------------------------------------------------
if __name__ == "__main__":
    B, CIN, H, W = 2, 4, 16, 16
    x = jax.random.normal(jax.random.PRNGKey(0), (B, CIN, H, W), jnp.float32)
    params = init_params(jax.random.PRNGKey(1), in_channels=CIN, img=(H, W))

    y = unet_forward(x, params, layernorm=True, activation="sigmoid")
    y = jax.block_until_ready(y)

    assert y.shape == (B, 3, H, W), y.shape
    assert bool(jnp.all(jnp.isfinite(y)))
    assert bool(jnp.all((y >= 0.0) & (y <= 1.0)))   # sigmoid output range

    y_ref = unet_reference(x, params, layernorm=True, activation="sigmoid")
    max_err = float(jnp.max(jnp.abs(y - y_ref)))
    assert max_err < 5e-2, f"mismatch vs reference: {max_err}"

    print("KERNEL_OK")
</pallas_src>

<mosaic_0001>
module attributes {stable_mosaic.version = 11 : i64} {
  func.func @_unet_kernel(%arg0: i32, %arg1: memref<1x4x256xf32, #tpu.memory_space<vmem>>, %arg2: memref<8x36xf32, #tpu.memory_space<vmem>>, %arg3: memref<8x1xf32, #tpu.memory_space<vmem>>, %arg4: memref<16x72xf32, #tpu.memory_space<vmem>>, %arg5: memref<16x1xf32, #tpu.memory_space<vmem>>, %arg6: memref<8x144xf32, #tpu.memory_space<vmem>>, %arg7: memref<8x72xf32, #tpu.memory_space<vmem>>, %arg8: memref<8x1xf32, #tpu.memory_space<vmem>>, %arg9: memref<3x8xf32, #tpu.memory_space<vmem>>, %arg10: memref<3x1xf32, #tpu.memory_space<vmem>>, %arg11: memref<3x256xf32, #tpu.memory_space<vmem>>, %arg12: memref<3x256xf32, #tpu.memory_space<vmem>>, %arg13: memref<1x3x256xf32, #tpu.memory_space<vmem>>) attributes {dimension_semantics = [#tpu.dimension_semantics<parallel>], iteration_bounds = array<i64: 2>, scalar_prefetch = 0 : i64, scratch_operands = 0 : i64, tpu.core_type = #tpu.core_type<tc>, window_params = [{transform_indices = @transform_0, window_bounds = array<i64: 1, 4, 256>}, {pipeline_mode = #tpu.pipeline_mode<synchronous>, transform_indices = @transform_1, window_bounds = array<i64: 8, 36>}, {pipeline_mode = #tpu.pipeline_mode<synchronous>, transform_indices = @transform_2, window_bounds = array<i64: 8, 1>}, {pipeline_mode = #tpu.pipeline_mode<synchronous>, transform_indices = @transform_3, window_bounds = array<i64: 16, 72>}, {pipeline_mode = #tpu.pipeline_mode<synchronous>, transform_indices = @transform_4, window_bounds = array<i64: 16, 1>}, {pipeline_mode = #tpu.pipeline_mode<synchronous>, transform_indices = @transform_5, window_bounds = array<i64: 8, 144>}, {pipeline_mode = #tpu.pipeline_mode<synchronous>, transform_indices = @transform_6, window_bounds = array<i64: 8, 72>}, {pipeline_mode = #tpu.pipeline_mode<synchronous>, transform_indices = @transform_7, window_bounds = array<i64: 8, 1>}, {pipeline_mode = #tpu.pipeline_mode<synchronous>, transform_indices = @transform_8, window_bounds = array<i64: 3, 8>}, {pipeline_mode = #tpu.pipeline_mode<synchronous>, transform_indices = @transform_9, window_bounds = array<i64: 3, 1>}, {pipeline_mode = #tpu.pipeline_mode<synchronous>, transform_indices = @transform_10, window_bounds = array<i64: 3, 256>}, {pipeline_mode = #tpu.pipeline_mode<synchronous>, transform_indices = @transform_11, window_bounds = array<i64: 3, 256>}, {transform_indices = @transform_12, window_bounds = array<i64: 1, 3, 256>}]} {
    %0 = tpu.iota {dimensions = array<i32: 1>} : vector<1x256xi32>
    %c15_i32 = arith.constant 15 : i32
    %1 = vector.broadcast %c15_i32 : i32 to vector<1x256xi32>
    %2 = arith.andi %0, %1 : vector<1x256xi32>
    %c0 = arith.constant 0 : index
    %c0_0 = arith.constant 0 : index
    %c0_1 = arith.constant 0 : index
    %3 = vector.load %arg1[%c0, %c0_0, %c0_1] : memref<1x4x256xf32, #tpu.memory_space<vmem>>, vector<1x4x256xf32>
    %4 = vector.shape_cast %3 : vector<1x4x256xf32> to vector<4x256xf32>
    %c0_2 = arith.constant 0 : index
    %c0_3 = arith.constant 0 : index
    %5 = vector.load %arg2[%c0_2, %c0_3] : memref<8x36xf32, #tpu.memory_space<vmem>>, vector<8x36xf32>
    %cst = arith.constant 0.000000e+00 : f32
    %6 = vector.broadcast %cst : f32 to vector<4x17xf32>
    %7 = vector.extract_strided_slice %4 {offsets = [0, 0], sizes = [4, 239], strides = [1, 1]} : vector<4x256xf32> to vector<4x239xf32>
    %8 = tpu.concatenate %6, %7 in 1 : vector<4x17xf32>, vector<4x239xf32> -> vector<4x256xf32>
    %c-1_i32 = arith.constant -1 : i32
    %9 = vector.broadcast %c-1_i32 : i32 to vector<1x256xi32>
    %10 = arith.addi %2, %9 : vector<1x256xi32>
    %c0_i32 = arith.constant 0 : i32
    %11 = vector.broadcast %c0_i32 : i32 to vector<1x256xi32>
    %12 = arith.cmpi sge, %10, %11 : vector<1x256xi32>
    %c-1_i32_4 = arith.constant -1 : i32
    %13 = vector.broadcast %c-1_i32_4 : i32 to vector<1x256xi32>
    %14 = arith.addi %2, %13 : vector<1x256xi32>
    %c16_i32 = arith.constant 16 : i32
    %15 = vector.broadcast %c16_i32 : i32 to vector<1x256xi32>
    %16 = arith.cmpi slt, %14, %15 : vector<1x256xi32>
    %17 = arith.andi %12, %16 : vector<1x256xi1>
    %cst_5 = arith.constant 0.000000e+00 : f32
    %18 = vector.shape_cast %17 : vector<1x256xi1> to vector<1x256xi1>
    %19 = vector.broadcast %18 : vector<1x256xi1> to vector<4x256xi1>
    %20 = vector.broadcast %cst_5 : f32 to vector<4x256xf32>
    %21 = arith.select %19, %8, %20 : vector<4x256xi1>, vector<4x256xf32>
    %cst_6 = arith.constant 0.000000e+00 : f32
    %22 = vector.broadcast %cst_6 : f32 to vector<4x16xf32>
    %23 = vector.extract_strided_slice %4 {offsets = [0, 0], sizes = [4, 240], strides = [1, 1]} : vector<4x256xf32> to vector<4x240xf32>
    %24 = tpu.concatenate %22, %23 in 1 : vector<4x16xf32>, vector<4x240xf32> -> vector<4x256xf32>
    %cst_7 = arith.constant 0.000000e+00 : f32
    %25 = vector.broadcast %cst_7 : f32 to vector<4x15xf32>
    %26 = vector.extract_strided_slice %4 {offsets = [0, 0], sizes = [4, 241], strides = [1, 1]} : vector<4x256xf32> to vector<4x241xf32>
    %27 = tpu.concatenate %25, %26 in 1 : vector<4x15xf32>, vector<4x241xf32> -> vector<4x256xf32>
    %c1_i32 = arith.constant 1 : i32
    %28 = vector.broadcast %c1_i32 : i32 to vector<1x256xi32>
    %29 = arith.addi %2, %28 : vector<1x256xi32>
    %c0_i32_8 = arith.constant 0 : i32
    %30 = vector.broadcast %c0_i32_8 : i32 to vector<1x256xi32>
    %31 = arith.cmpi sge, %29, %30 : vector<1x256xi32>
    %c1_i32_9 = arith.constant 1 : i32
    %32 = vector.broadcast %c1_i32_9 : i32 to vector<1x256xi32>
    %33 = arith.addi %2, %32 : vector<1x256xi32>
    %c16_i32_10 = arith.constant 16 : i32
    %34 = vector.broadcast %c16_i32_10 : i32 to vector<1x256xi32>
    %35 = arith.cmpi slt, %33, %34 : vector<1x256xi32>
    %36 = arith.andi %31, %35 : vector<1x256xi1>
    %cst_11 = arith.constant 0.000000e+00 : f32
    %37 = vector.shape_cast %36 : vector<1x256xi1> to vector<1x256xi1>
    %38 = vector.broadcast %37 : vector<1x256xi1> to vector<4x256xi1>
    %39 = vector.broadcast %cst_11 : f32 to vector<4x256xf32>
    %40 = arith.select %38, %27, %39 : vector<4x256xi1>, vector<4x256xf32>
    %cst_12 = arith.constant 0.000000e+00 : f32
    %41 = vector.broadcast %cst_12 : f32 to vector<4x1xf32>
    %42 = vector.extract_strided_slice %4 {offsets = [0, 0], sizes = [4, 255], strides = [1, 1]} : vector<4x256xf32> to vector<4x255xf32>
    %43 = tpu.concatenate %41, %42 in 1 : vector<4x1xf32>, vector<4x255xf32> -> vector<4x256xf32>
    %c-1_i32_13 = arith.constant -1 : i32
    %44 = vector.broadcast %c-1_i32_13 : i32 to vector<1x256xi32>
    %45 = arith.addi %2, %44 : vector<1x256xi32>
    %c0_i32_14 = arith.constant 0 : i32
    %46 = vector.broadcast %c0_i32_14 : i32 to vector<1x256xi32>
    %47 = arith.cmpi sge, %45, %46 : vector<1x256xi32>
    %c-1_i32_15 = arith.constant -1 : i32
    %48 = vector.broadcast %c-1_i32_15 : i32 to vector<1x256xi32>
    %49 = arith.addi %2, %48 : vector<1x256xi32>
    %c16_i32_16 = arith.constant 16 : i32
    %50 = vector.broadcast %c16_i32_16 : i32 to vector<1x256xi32>
    %51 = arith.cmpi slt, %49, %50 : vector<1x256xi32>
    %52 = arith.andi %47, %51 : vector<1x256xi1>
    %cst_17 = arith.constant 0.000000e+00 : f32
    %53 = vector.shape_cast %52 : vector<1x256xi1> to vector<1x256xi1>
    %54 = vector.broadcast %53 : vector<1x256xi1> to vector<4x256xi1>
    %55 = vector.broadcast %cst_17 : f32 to vector<4x256xf32>
    %56 = arith.select %54, %43, %55 : vector<4x256xi1>, vector<4x256xf32>
    %cst_18 = arith.constant 0.000000e+00 : f32
    %57 = vector.broadcast %cst_18 : f32 to vector<4x1xf32>
    %58 = vector.extract_strided_slice %4 {offsets = [0, 1], sizes = [4, 255], strides = [1, 1]} : vector<4x256xf32> to vector<4x255xf32>
    %59 = tpu.concatenate %58, %57 in 1 : vector<4x255xf32>, vector<4x1xf32> -> vector<4x256xf32>
    %c1_i32_19 = arith.constant 1 : i32
    %60 = vector.broadcast %c1_i32_19 : i32 to vector<1x256xi32>
    %61 = arith.addi %2, %60 : vector<1x256xi32>
    %c0_i32_20 = arith.constant 0 : i32
    %62 = vector.broadcast %c0_i32_20 : i32 to vector<1x256xi32>
    %63 = arith.cmpi sge, %61, %62 : vector<1x256xi32>
    %c1_i32_21 = arith.constant 1 : i32
    %64 = vector.broadcast %c1_i32_21 : i32 to vector<1x256xi32>
    %65 = arith.addi %2, %64 : vector<1x256xi32>
    %c16_i32_22 = arith.constant 16 : i32
    %66 = vector.broadcast %c16_i32_22 : i32 to vector<1x256xi32>
    %67 = arith.cmpi slt, %65, %66 : vector<1x256xi32>
    %68 = arith.andi %63, %67 : vector<1x256xi1>
    %cst_23 = arith.constant 0.000000e+00 : f32
    %69 = vector.shape_cast %68 : vector<1x256xi1> to vector<1x256xi1>
    %70 = vector.broadcast %69 : vector<1x256xi1> to vector<4x256xi1>
    %71 = vector.broadcast %cst_23 : f32 to vector<4x256xf32>
    %72 = arith.select %70, %59, %71 : vector<4x256xi1>, vector<4x256xf32>
    %cst_24 = arith.constant 0.000000e+00 : f32
    %73 = vector.broadcast %cst_24 : f32 to vector<4x15xf32>
    %74 = vector.extract_strided_slice %4 {offsets = [0, 15], sizes = [4, 241], strides = [1, 1]} : vector<4x256xf32> to vector<4x241xf32>
    %75 = tpu.concatenate %74, %73 in 1 : vector<4x241xf32>, vector<4x15xf32> -> vector<4x256xf32>
    %c-1_i32_25 = arith.constant -1 : i32
    %76 = vector.broadcast %c-1_i32_25 : i32 to vector<1x256xi32>
    %77 = arith.addi %2, %76 : vector<1x256xi32>
    %c0_i32_26 = arith.constant 0 : i32
    %78 = vector.broadcast %c0_i32_26 : i32 to vector<1x256xi32>
    %79 = arith.cmpi sge, %77, %78 : vector<1x256xi32>
    %c-1_i32_27 = arith.constant -1 : i32
    %80 = vector.broadcast %c-1_i32_27 : i32 to vector<1x256xi32>
    %81 = arith.addi %2, %80 : vector<1x256xi32>
    %c16_i32_28 = arith.constant 16 : i32
    %82 = vector.broadcast %c16_i32_28 : i32 to vector<1x256xi32>
    %83 = arith.cmpi slt, %81, %82 : vector<1x256xi32>
    %84 = arith.andi %79, %83 : vector<1x256xi1>
    %cst_29 = arith.constant 0.000000e+00 : f32
    %85 = vector.shape_cast %84 : vector<1x256xi1> to vector<1x256xi1>
    %86 = vector.broadcast %85 : vector<1x256xi1> to vector<4x256xi1>
    %87 = vector.broadcast %cst_29 : f32 to vector<4x256xf32>
    %88 = arith.select %86, %75, %87 : vector<4x256xi1>, vector<4x256xf32>
    %cst_30 = arith.constant 0.000000e+00 : f32
    %89 = vector.broadcast %cst_30 : f32 to vector<4x16xf32>
    %90 = vector.extract_strided_slice %4 {offsets = [0, 16], sizes = [4, 240], strides = [1, 1]} : vector<4x256xf32> to vector<4x240xf32>
    %91 = tpu.concatenate %90, %89 in 1 : vector<4x240xf32>, vector<4x16xf32> -> vector<4x256xf32>
    %cst_31 = arith.constant 0.000000e+00 : f32
    %92 = vector.broadcast %cst_31 : f32 to vector<4x17xf32>
    %93 = vector.extract_strided_slice %4 {offsets = [0, 17], sizes = [4, 239], strides = [1, 1]} : vector<4x256xf32> to vector<4x239xf32>
    %94 = tpu.concatenate %93, %92 in 1 : vector<4x239xf32>, vector<4x17xf32> -> vector<4x256xf32>
    %c1_i32_32 = arith.constant 1 : i32
    %95 = vector.broadcast %c1_i32_32 : i32 to vector<1x256xi32>
    %96 = arith.addi %2, %95 : vector<1x256xi32>
    %c0_i32_33 = arith.constant 0 : i32
    %97 = vector.broadcast %c0_i32_33 : i32 to vector<1x256xi32>
    %98 = arith.cmpi sge, %96, %97 : vector<1x256xi32>
    %c1_i32_34 = arith.constant 1 : i32
    %99 = vector.broadcast %c1_i32_34 : i32 to vector<1x256xi32>
    %100 = arith.addi %2, %99 : vector<1x256xi32>
    %c16_i32_35 = arith.constant 16 : i32
    %101 = vector.broadcast %c16_i32_35 : i32 to vector<1x256xi32>
    %102 = arith.cmpi slt, %100, %101 : vector<1x256xi32>
    %103 = arith.andi %98, %102 : vector<1x256xi1>
    %cst_36 = arith.constant 0.000000e+00 : f32
    %104 = vector.shape_cast %103 : vector<1x256xi1> to vector<1x256xi1>
    %105 = vector.broadcast %104 : vector<1x256xi1> to vector<4x256xi1>
    %106 = vector.broadcast %cst_36 : f32 to vector<4x256xf32>
    %107 = arith.select %105, %94, %106 : vector<4x256xi1>, vector<4x256xf32>
    %108 = tpu.concatenate %21, %24, %40, %56, %4, %72, %88, %91, %107 in 0 : vector<4x256xf32>, vector<4x256xf32>, vector<4x256xf32>, vector<4x256xf32>, vector<4x256xf32>, vector<4x256xf32>, vector<4x256xf32>, vector<4x256xf32>, vector<4x256xf32> -> vector<36x256xf32>
    %cst_37 = arith.constant dense<0.000000e+00> : vector<8x256xf32>
    %109 = tpu.matmul %5, %108, %cst_37 {dimension_numbers = #tpu.dot_dimension_numbers<[1], [0], [0], [1], [0, 0, 1, 1], [], []>} : vector<8x36xf32>, vector<36x256xf32>, vector<8x256xf32> -> vector<8x256xf32>
    %c0_38 = arith.constant 0 : index
    %c0_39 = arith.constant 0 : index
    %110 = vector.load %arg3[%c0_38, %c0_39] : memref<8x1xf32, #tpu.memory_space<vmem>>, vector<8x1xf32>
    %111 = vector.broadcast %110 : vector<8x1xf32> to vector<8x256xf32>
    %112 = arith.addf %109, %111 : vector<8x256xf32>
    %cst_40 = arith.constant 0.000000e+00 : f32
    %113 = vector.broadcast %cst_40 : f32 to vector<8x256xf32>
    %114 = arith.maximumf %112, %113 : vector<8x256xf32>
    %c16_i32_41 = arith.constant 16 : i32
    %115 = vector.broadcast %c16_i32_41 : i32 to vector<1x256xi32>
    %116 = arith.andi %0, %115 : vector<1x256xi32>
    %c0_i32_42 = arith.constant 0 : i32
    %117 = vector.broadcast %c0_i32_42 : i32 to vector<1x256xi32>
    %118 = arith.cmpi ne, %116, %117 : vector<1x256xi32>
    %cst_43 = arith.constant 0.000000e+00 : f32
    %119 = vector.broadcast %cst_43 : f32 to vector<8x16xf32>
    %120 = vector.extract_strided_slice %114 {offsets = [0, 0], sizes = [8, 240], strides = [1, 1]} : vector<8x256xf32> to vector<8x240xf32>
    %121 = tpu.concatenate %119, %120 in 1 : vector<8x16xf32>, vector<8x240xf32> -> vector<8x256xf32>
    %cst_44 = arith.constant 0.000000e+00 : f32
    %122 = vector.broadcast %cst_44 : f32 to vector<8x16xf32>
    %123 = vector.extract_strided_slice %114 {offsets = [0, 16], sizes = [8, 240], strides = [1, 1]} : vector<8x256xf32> to vector<8x240xf32>
    %124 = tpu.concatenate %123, %122 in 1 : vector<8x240xf32>, vector<8x16xf32> -> vector<8x256xf32>
    %125 = vector.shape_cast %118 : vector<1x256xi1> to vector<1x256xi1>
    %126 = vector.broadcast %125 : vector<1x256xi1> to vector<8x256xi1>
    %127 = arith.select %126, %121, %124 : vector<8x256xi1>, vector<8x256xf32>
    %128 = arith.maximumf %114, %127 : vector<8x256xf32>
    %c1_i32_45 = arith.constant 1 : i32
    %129 = vector.broadcast %c1_i32_45 : i32 to vector<1x256xi32>
    %130 = arith.andi %0, %129 : vector<1x256xi32>
    %c0_i32_46 = arith.constant 0 : i32
    %131 = vector.broadcast %c0_i32_46 : i32 to vector<1x256xi32>
    %132 = arith.cmpi ne, %130, %131 : vector<1x256xi32>
    %cst_47 = arith.constant 0.000000e+00 : f32
    %133 = vector.broadcast %cst_47 : f32 to vector<8x1xf32>
    %134 = vector.extract_strided_slice %128 {offsets = [0, 0], sizes = [8, 255], strides = [1, 1]} : vector<8x256xf32> to vector<8x255xf32>
    %135 = tpu.concatenate %133, %134 in 1 : vector<8x1xf32>, vector<8x255xf32> -> vector<8x256xf32>
    %cst_48 = arith.constant 0.000000e+00 : f32
    %136 = vector.broadcast %cst_48 : f32 to vector<8x1xf32>
    %137 = vector.extract_strided_slice %128 {offsets = [0, 1], sizes = [8, 255], strides = [1, 1]} : vector<8x256xf32> to vector<8x255xf32>
    %138 = tpu.concatenate %137, %136 in 1 : vector<8x255xf32>, vector<8x1xf32> -> vector<8x256xf32>
    %139 = vector.shape_cast %132 : vector<1x256xi1> to vector<1x256xi1>
    %140 = vector.broadcast %139 : vector<1x256xi1> to vector<8x256xi1>
    %141 = arith.select %140, %135, %138 : vector<8x256xi1>, vector<8x256xf32>
    %142 = arith.maximumf %128, %141 : vector<8x256xf32>
    %c0_49 = arith.constant 0 : index
    %c0_50 = arith.constant 0 : index
    %143 = vector.load %arg4[%c0_49, %c0_50] : memref<16x72xf32, #tpu.memory_space<vmem>>, vector<16x72xf32>
    %cst_51 = arith.constant 0.000000e+00 : f32
    %144 = vector.broadcast %cst_51 : f32 to vector<8x34xf32>
    %145 = vector.extract_strided_slice %142 {offsets = [0, 0], sizes = [8, 222], strides = [1, 1]} : vector<8x256xf32> to vector<8x222xf32>
    %146 = tpu.concatenate %144, %145 in 1 : vector<8x34xf32>, vector<8x222xf32> -> vector<8x256xf32>
    %c-2_i32 = arith.constant -2 : i32
    %147 = vector.broadcast %c-2_i32 : i32 to vector<1x256xi32>
    %148 = arith.addi %2, %147 : vector<1x256xi32>
    %c0_i32_52 = arith.constant 0 : i32
    %149 = vector.broadcast %c0_i32_52 : i32 to vector<1x256xi32>
    %150 = arith.cmpi sge, %148, %149 : vector<1x256xi32>
    %c-2_i32_53 = arith.constant -2 : i32
    %151 = vector.broadcast %c-2_i32_53 : i32 to vector<1x256xi32>
    %152 = arith.addi %2, %151 : vector<1x256xi32>
    %c16_i32_54 = arith.constant 16 : i32
    %153 = vector.broadcast %c16_i32_54 : i32 to vector<1x256xi32>
    %154 = arith.cmpi slt, %152, %153 : vector<1x256xi32>
    %155 = arith.andi %150, %154 : vector<1x256xi1>
    %cst_55 = arith.constant 0.000000e+00 : f32
    %156 = vector.shape_cast %155 : vector<1x256xi1> to vector<1x256xi1>
    %157 = vector.broadcast %156 : vector<1x256xi1> to vector<8x256xi1>
    %158 = vector.broadcast %cst_55 : f32 to vector<8x256xf32>
    %159 = arith.select %157, %146, %158 : vector<8x256xi1>, vector<8x256xf32>
    %cst_56 = arith.constant 0.000000e+00 : f32
    %160 = vector.broadcast %cst_56 : f32 to vector<8x32xf32>
    %161 = vector.extract_strided_slice %142 {offsets = [0, 0], sizes = [8, 224], strides = [1, 1]} : vector<8x256xf32> to vector<8x224xf32>
    %162 = tpu.concatenate %160, %161 in 1 : vector<8x32xf32>, vector<8x224xf32> -> vector<8x256xf32>
    %cst_57 = arith.constant 0.000000e+00 : f32
    %163 = vector.broadcast %cst_57 : f32 to vector<8x30xf32>
    %164 = vector.extract_strided_slice %142 {offsets = [0, 0], sizes = [8, 226], strides = [1, 1]} : vector<8x256xf32> to vector<8x226xf32>
    %165 = tpu.concatenate %163, %164 in 1 : vector<8x30xf32>, vector<8x226xf32> -> vector<8x256xf32>
    %c2_i32 = arith.constant 2 : i32
    %166 = vector.broadcast %c2_i32 : i32 to vector<1x256xi32>
    %167 = arith.addi %2, %166 : vector<1x256xi32>
    %c0_i32_58 = arith.constant 0 : i32
    %168 = vector.broadcast %c0_i32_58 : i32 to vector<1x256xi32>
    %169 = arith.cmpi sge, %167, %168 : vector<1x256xi32>
    %c2_i32_59 = arith.constant 2 : i32
    %170 = vector.broadcast %c2_i32_59 : i32 to vector<1x256xi32>
    %171 = arith.addi %2, %170 : vector<1x256xi32>
    %c16_i32_60 = arith.constant 16 : i32
    %172 = vector.broadcast %c16_i32_60 : i32 to vector<1x256xi32>
    %173 = arith.cmpi slt, %171, %172 : vector<1x256xi32>
    %174 = arith.andi %169, %173 : vector<1x256xi1>
    %cst_61 = arith.constant 0.000000e+00 : f32
    %175 = vector.shape_cast %174 : vector<1x256xi1> to vector<1x256xi1>
    %176 = vector.broadcast %175 : vector<1x256xi1> to vector<8x256xi1>
    %177 = vector.broadcast %cst_61 : f32 to vector<8x256xf32>
    %178 = arith.select %176, %165, %177 : vector<8x256xi1>, vector<8x256xf32>
    %cst_62 = arith.constant 0.000000e+00 : f32
    %179 = vector.broadcast %cst_62 : f32 to vector<8x2xf32>
    %180 = vector.extract_strided_slice %142 {offsets = [0, 0], sizes = [8, 254], strides = [1, 1]} : vector<8x256xf32> to vector<8x254xf32>
    %181 = tpu.concatenate %179, %180 in 1 : vector<8x2xf32>, vector<8x254xf32> -> vector<8x256xf32>
    %c-2_i32_63 = arith.constant -2 : i32
    %182 = vector.broadcast %c-2_i32_63 : i32 to vector<1x256xi32>
    %183 = arith.addi %2, %182 : vector<1x256xi32>
    %c0_i32_64 = arith.constant 0 : i32
    %184 = vector.broadcast %c0_i32_64 : i32 to vector<1x256xi32>
    %185 = arith.cmpi sge, %183, %184 : vector<1x256xi32>
    %c-2_i32_65 = arith.constant -2 : i32
    %186 = vector.broadcast %c-2_i32_65 : i32 to vector<1x256xi32>
    %187 = arith.addi %2, %186 : vector<1x256xi32>
    %c16_i32_66 = arith.constant 16 : i32
    %188 = vector.broadcast %c16_i32_66 : i32 to vector<1x256xi32>
    %189 = arith.cmpi slt, %187, %188 : vector<1x256xi32>
    %190 = arith.andi %185, %189 : vector<1x256xi1>
    %cst_67 = arith.constant 0.000000e+00 : f32
    %191 = vector.shape_cast %190 : vector<1x256xi1> to vector<1x256xi1>
    %192 = vector.broadcast %191 : vector<1x256xi1> to vector<8x256xi1>
    %193 = vector.broadcast %cst_67 : f32 to vector<8x256xf32>
    %194 = arith.select %192, %181, %193 : vector<8x256xi1>, vector<8x256xf32>
    %cst_68 = arith.constant 0.000000e+00 : f32
    %195 = vector.broadcast %cst_68 : f32 to vector<8x2xf32>
    %196 = vector.extract_strided_slice %142 {offsets = [0, 2], sizes = [8, 254], strides = [1, 1]} : vector<8x256xf32> to vector<8x254xf32>
    %197 = tpu.concatenate %196, %195 in 1 : vector<8x254xf32>, vector<8x2xf32> -> vector<8x256xf32>
    %c2_i32_69 = arith.constant 2 : i32
    %198 = vector.broadcast %c2_i32_69 : i32 to vector<1x256xi32>
    %199 = arith.addi %2, %198 : vector<1x256xi32>
    %c0_i32_70 = arith.constant 0 : i32
    %200 = vector.broadcast %c0_i32_70 : i32 to vector<1x256xi32>
    %201 = arith.cmpi sge, %199, %200 : vector<1x256xi32>
    %c2_i32_71 = arith.constant 2 : i32
    %202 = vector.broadcast %c2_i32_71 : i32 to vector<1x256xi32>
    %203 = arith.addi %2, %202 : vector<1x256xi32>
    %c16_i32_72 = arith.constant 16 : i32
    %204 = vector.broadcast %c16_i32_72 : i32 to vector<1x256xi32>
    %205 = arith.cmpi slt, %203, %204 : vector<1x256xi32>
    %206 = arith.andi %201, %205 : vector<1x256xi1>
    %cst_73 = arith.constant 0.000000e+00 : f32
    %207 = vector.shape_cast %206 : vector<1x256xi1> to vector<1x256xi1>
    %208 = vector.broadcast %207 : vector<1x256xi1> to vector<8x256xi1>
    %209 = vector.broadcast %cst_73 : f32 to vector<8x256xf32>
    %210 = arith.select %208, %197, %209 : vector<8x256xi1>, vector<8x256xf32>
    %cst_74 = arith.constant 0.000000e+00 : f32
    %211 = vector.broadcast %cst_74 : f32 to vector<8x30xf32>
    %212 = vector.extract_strided_slice %142 {offsets = [0, 30], sizes = [8, 226], strides = [1, 1]} : vector<8x256xf32> to vector<8x226xf32>
    %213 = tpu.concatenate %212, %211 in 1 : vector<8x226xf32>, vector<8x30xf32> -> vector<8x256xf32>
    %c-2_i32_75 = arith.constant -2 : i32
    %214 = vector.broadcast %c-2_i32_75 : i32 to vector<1x256xi32>
    %215 = arith.addi %2, %214 : vector<1x256xi32>
    %c0_i32_76 = arith.constant 0 : i32
    %216 = vector.broadcast %c0_i32_76 : i32 to vector<1x256xi32>
    %217 = arith.cmpi sge, %215, %216 : vector<1x256xi32>
    %c-2_i32_77 = arith.constant -2 : i32
    %218 = vector.broadcast %c-2_i32_77 : i32 to vector<1x256xi32>
    %219 = arith.addi %2, %218 : vector<1x256xi32>
    %c16_i32_78 = arith.constant 16 : i32
    %220 = vector.broadcast %c16_i32_78 : i32 to vector<1x256xi32>
    %221 = arith.cmpi slt, %219, %220 : vector<1x256xi32>
    %222 = arith.andi %217, %221 : vector<1x256xi1>
    %cst_79 = arith.constant 0.000000e+00 : f32
    %223 = vector.shape_cast %222 : vector<1x256xi1> to vector<1x256xi1>
    %224 = vector.broadcast %223 : vector<1x256xi1> to vector<8x256xi1>
    %225 = vector.broadcast %cst_79 : f32 to vector<8x256xf32>
    %226 = arith.select %224, %213, %225 : vector<8x256xi1>, vector<8x256xf32>
    %cst_80 = arith.constant 0.000000e+00 : f32
    %227 = vector.broadcast %cst_80 : f32 to vector<8x32xf32>
    %228 = vector.extract_strided_slice %142 {offsets = [0, 32], sizes = [8, 224], strides = [1, 1]} : vector<8x256xf32> to vector<8x224xf32>
    %229 = tpu.concatenate %228, %227 in 1 : vector<8x224xf32>, vector<8x32xf32> -> vector<8x256xf32>
    %cst_81 = arith.constant 0.000000e+00 : f32
    %230 = vector.broadcast %cst_81 : f32 to vector<8x34xf32>
    %231 = vector.extract_strided_slice %142 {offsets = [0, 34], sizes = [8, 222], strides = [1, 1]} : vector<8x256xf32> to vector<8x222xf32>
    %232 = tpu.concatenate %231, %230 in 1 : vector<8x222xf32>, vector<8x34xf32> -> vector<8x256xf32>
    %c2_i32_82 = arith.constant 2 : i32
    %233 = vector.broadcast %c2_i32_82 : i32 to vector<1x256xi32>
    %234 = arith.addi %2, %233 : vector<1x256xi32>
    %c0_i32_83 = arith.constant 0 : i32
    %235 = vector.broadcast %c0_i32_83 : i32 to vector<1x256xi32>
    %236 = arith.cmpi sge, %234, %235 : vector<1x256xi32>
    %c2_i32_84 = arith.constant 2 : i32
    %237 = vector.broadcast %c2_i32_84 : i32 to vector<1x256xi32>
    %238 = arith.addi %2, %237 : vector<1x256xi32>
    %c16_i32_85 = arith.constant 16 : i32
    %239 = vector.broadcast %c16_i32_85 : i32 to vector<1x256xi32>
    %240 = arith.cmpi slt, %238, %239 : vector<1x256xi32>
    %241 = arith.andi %236, %240 : vector<1x256xi1>
    %cst_86 = arith.constant 0.000000e+00 : f32
    %242 = vector.shape_cast %241 : vector<1x256xi1> to vector<1x256xi1>
    %243 = vector.broadcast %242 : vector<1x256xi1> to vector<8x256xi1>
    %244 = vector.broadcast %cst_86 : f32 to vector<8x256xf32>
    %245 = arith.select %243, %232, %244 : vector<8x256xi1>, vector<8x256xf32>
    %246 = tpu.concatenate %159, %162, %178, %194, %142, %210, %226, %229, %245 in 0 : vector<8x256xf32>, vector<8x256xf32>, vector<8x256xf32>, vector<8x256xf32>, vector<8x256xf32>, vector<8x256xf32>, vector<8x256xf32>, vector<8x256xf32>, vector<8x256xf32> -> vector<72x256xf32>
    %cst_87 = arith.constant dense<0.000000e+00> : vector<16x256xf32>
    %247 = tpu.matmul %143, %246, %cst_87 {dimension_numbers = #tpu.dot_dimension_numbers<[1], [0], [0], [1], [0, 0, 1, 1], [], []>} : vector<16x72xf32>, vector<72x256xf32>, vector<16x256xf32> -> vector<16x256xf32>
    %c0_88 = arith.constant 0 : index
    %c0_89 = arith.constant 0 : index
    %248 = vector.load %arg5[%c0_88, %c0_89] : memref<16x1xf32, #tpu.memory_space<vmem>>, vector<16x1xf32>
    %249 = vector.broadcast %248 : vector<16x1xf32> to vector<16x256xf32>
    %250 = arith.addf %247, %249 : vector<16x256xf32>
    %cst_90 = arith.constant 0.000000e+00 : f32
    %251 = vector.broadcast %cst_90 : f32 to vector<16x256xf32>
    %252 = arith.maximumf %250, %251 : vector<16x256xf32>
    %c0_91 = arith.constant 0 : index
    %c0_92 = arith.constant 0 : index
    %253 = vector.load %arg6[%c0_91, %c0_92] : memref<8x144xf32, #tpu.memory_space<vmem>>, vector<8x144xf32>
    %cst_93 = arith.constant 0.000000e+00 : f32
    %254 = vector.broadcast %cst_93 : f32 to vector<16x17xf32>
    %255 = vector.extract_strided_slice %252 {offsets = [0, 0], sizes = [16, 239], strides = [1, 1]} : vector<16x256xf32> to vector<16x239xf32>
    %256 = tpu.concatenate %254, %255 in 1 : vector<16x17xf32>, vector<16x239xf32> -> vector<16x256xf32>
    %c-1_i32_94 = arith.constant -1 : i32
    %257 = vector.broadcast %c-1_i32_94 : i32 to vector<1x256xi32>
    %258 = arith.addi %2, %257 : vector<1x256xi32>
    %c0_i32_95 = arith.constant 0 : i32
    %259 = vector.broadcast %c0_i32_95 : i32 to vector<1x256xi32>
    %260 = arith.cmpi sge, %258, %259 : vector<1x256xi32>
    %c-1_i32_96 = arith.constant -1 : i32
    %261 = vector.broadcast %c-1_i32_96 : i32 to vector<1x256xi32>
    %262 = arith.addi %2, %261 : vector<1x256xi32>
    %c16_i32_97 = arith.constant 16 : i32
    %263 = vector.broadcast %c16_i32_97 : i32 to vector<1x256xi32>
    %264 = arith.cmpi slt, %262, %263 : vector<1x256xi32>
    %265 = arith.andi %260, %264 : vector<1x256xi1>
    %cst_98 = arith.constant 0.000000e+00 : f32
    %266 = vector.shape_cast %265 : vector<1x256xi1> to vector<1x256xi1>
    %267 = vector.broadcast %266 : vector<1x256xi1> to vector<16x256xi1>
    %268 = vector.broadcast %cst_98 : f32 to vector<16x256xf32>
    %269 = arith.select %267, %256, %268 : vector<16x256xi1>, vector<16x256xf32>
    %cst_99 = arith.constant 0.000000e+00 : f32
    %270 = vector.broadcast %cst_99 : f32 to vector<16x16xf32>
    %271 = vector.extract_strided_slice %252 {offsets = [0, 0], sizes = [16, 240], strides = [1, 1]} : vector<16x256xf32> to vector<16x240xf32>
    %272 = tpu.concatenate %270, %271 in 1 : vector<16x16xf32>, vector<16x240xf32> -> vector<16x256xf32>
    %cst_100 = arith.constant 0.000000e+00 : f32
    %273 = vector.broadcast %cst_100 : f32 to vector<16x15xf32>
    %274 = vector.extract_strided_slice %252 {offsets = [0, 0], sizes = [16, 241], strides = [1, 1]} : vector<16x256xf32> to vector<16x241xf32>
    %275 = tpu.concatenate %273, %274 in 1 : vector<16x15xf32>, vector<16x241xf32> -> vector<16x256xf32>
    %c1_i32_101 = arith.constant 1 : i32
    %276 = vector.broadcast %c1_i32_101 : i32 to vector<1x256xi32>
    %277 = arith.addi %2, %276 : vector<1x256xi32>
    %c0_i32_102 = arith.constant 0 : i32
    %278 = vector.broadcast %c0_i32_102 : i32 to vector<1x256xi32>
    %279 = arith.cmpi sge, %277, %278 : vector<1x256xi32>
    %c1_i32_103 = arith.constant 1 : i32
    %280 = vector.broadcast %c1_i32_103 : i32 to vector<1x256xi32>
    %281 = arith.addi %2, %280 : vector<1x256xi32>
    %c16_i32_104 = arith.constant 16 : i32
    %282 = vector.broadcast %c16_i32_104 : i32 to vector<1x256xi32>
    %283 = arith.cmpi slt, %281, %282 : vector<1x256xi32>
    %284 = arith.andi %279, %283 : vector<1x256xi1>
    %cst_105 = arith.constant 0.000000e+00 : f32
    %285 = vector.shape_cast %284 : vector<1x256xi1> to vector<1x256xi1>
    %286 = vector.broadcast %285 : vector<1x256xi1> to vector<16x256xi1>
    %287 = vector.broadcast %cst_105 : f32 to vector<16x256xf32>
    %288 = arith.select %286, %275, %287 : vector<16x256xi1>, vector<16x256xf32>
    %cst_106 = arith.constant 0.000000e+00 : f32
    %289 = vector.broadcast %cst_106 : f32 to vector<16x1xf32>
    %290 = vector.extract_strided_slice %252 {offsets = [0, 0], sizes = [16, 255], strides = [1, 1]} : vector<16x256xf32> to vector<16x255xf32>
    %291 = tpu.concatenate %289, %290 in 1 : vector<16x1xf32>, vector<16x255xf32> -> vector<16x256xf32>
    %c-1_i32_107 = arith.constant -1 : i32
    %292 = vector.broadcast %c-1_i32_107 : i32 to vector<1x256xi32>
    %293 = arith.addi %2, %292 : vector<1x256xi32>
    %c0_i32_108 = arith.constant 0 : i32
    %294 = vector.broadcast %c0_i32_108 : i32 to vector<1x256xi32>
    %295 = arith.cmpi sge, %293, %294 : vector<1x256xi32>
    %c-1_i32_109 = arith.constant -1 : i32
    %296 = vector.broadcast %c-1_i32_109 : i32 to vector<1x256xi32>
    %297 = arith.addi %2, %296 : vector<1x256xi32>
    %c16_i32_110 = arith.constant 16 : i32
    %298 = vector.broadcast %c16_i32_110 : i32 to vector<1x256xi32>
    %299 = arith.cmpi slt, %297, %298 : vector<1x256xi32>
    %300 = arith.andi %295, %299 : vector<1x256xi1>
    %cst_111 = arith.constant 0.000000e+00 : f32
    %301 = vector.shape_cast %300 : vector<1x256xi1> to vector<1x256xi1>
    %302 = vector.broadcast %301 : vector<1x256xi1> to vector<16x256xi1>
    %303 = vector.broadcast %cst_111 : f32 to vector<16x256xf32>
    %304 = arith.select %302, %291, %303 : vector<16x256xi1>, vector<16x256xf32>
    %cst_112 = arith.constant 0.000000e+00 : f32
    %305 = vector.broadcast %cst_112 : f32 to vector<16x1xf32>
    %306 = vector.extract_strided_slice %252 {offsets = [0, 1], sizes = [16, 255], strides = [1, 1]} : vector<16x256xf32> to vector<16x255xf32>
    %307 = tpu.concatenate %306, %305 in 1 : vector<16x255xf32>, vector<16x1xf32> -> vector<16x256xf32>
    %c1_i32_113 = arith.constant 1 : i32
    %308 = vector.broadcast %c1_i32_113 : i32 to vector<1x256xi32>
    %309 = arith.addi %2, %308 : vector<1x256xi32>
    %c0_i32_114 = arith.constant 0 : i32
    %310 = vector.broadcast %c0_i32_114 : i32 to vector<1x256xi32>
    %311 = arith.cmpi sge, %309, %310 : vector<1x256xi32>
    %c1_i32_115 = arith.constant 1 : i32
    %312 = vector.broadcast %c1_i32_115 : i32 to vector<1x256xi32>
    %313 = arith.addi %2, %312 : vector<1x256xi32>
    %c16_i32_116 = arith.constant 16 : i32
    %314 = vector.broadcast %c16_i32_116 : i32 to vector<1x256xi32>
    %315 = arith.cmpi slt, %313, %314 : vector<1x256xi32>
    %316 = arith.andi %311, %315 : vector<1x256xi1>
    %cst_117 = arith.constant 0.000000e+00 : f32
    %317 = vector.shape_cast %316 : vector<1x256xi1> to vector<1x256xi1>
    %318 = vector.broadcast %317 : vector<1x256xi1> to vector<16x256xi1>
    %319 = vector.broadcast %cst_117 : f32 to vector<16x256xf32>
    %320 = arith.select %318, %307, %319 : vector<16x256xi1>, vector<16x256xf32>
    %cst_118 = arith.constant 0.000000e+00 : f32
    %321 = vector.broadcast %cst_118 : f32 to vector<16x15xf32>
    %322 = vector.extract_strided_slice %252 {offsets = [0, 15], sizes = [16, 241], strides = [1, 1]} : vector<16x256xf32> to vector<16x241xf32>
    %323 = tpu.concatenate %322, %321 in 1 : vector<16x241xf32>, vector<16x15xf32> -> vector<16x256xf32>
    %c-1_i32_119 = arith.constant -1 : i32
    %324 = vector.broadcast %c-1_i32_119 : i32 to vector<1x256xi32>
    %325 = arith.addi %2, %324 : vector<1x256xi32>
    %c0_i32_120 = arith.constant 0 : i32
    %326 = vector.broadcast %c0_i32_120 : i32 to vector<1x256xi32>
    %327 = arith.cmpi sge, %325, %326 : vector<1x256xi32>
    %c-1_i32_121 = arith.constant -1 : i32
    %328 = vector.broadcast %c-1_i32_121 : i32 to vector<1x256xi32>
    %329 = arith.addi %2, %328 : vector<1x256xi32>
    %c16_i32_122 = arith.constant 16 : i32
    %330 = vector.broadcast %c16_i32_122 : i32 to vector<1x256xi32>
    %331 = arith.cmpi slt, %329, %330 : vector<1x256xi32>
    %332 = arith.andi %327, %331 : vector<1x256xi1>
    %cst_123 = arith.constant 0.000000e+00 : f32
    %333 = vector.shape_cast %332 : vector<1x256xi1> to vector<1x256xi1>
    %334 = vector.broadcast %333 : vector<1x256xi1> to vector<16x256xi1>
    %335 = vector.broadcast %cst_123 : f32 to vector<16x256xf32>
    %336 = arith.select %334, %323, %335 : vector<16x256xi1>, vector<16x256xf32>
    %cst_124 = arith.constant 0.000000e+00 : f32
    %337 = vector.broadcast %cst_124 : f32 to vector<16x16xf32>
    %338 = vector.extract_strided_slice %252 {offsets = [0, 16], sizes = [16, 240], strides = [1, 1]} : vector<16x256xf32> to vector<16x240xf32>
    %339 = tpu.concatenate %338, %337 in 1 : vector<16x240xf32>, vector<16x16xf32> -> vector<16x256xf32>
    %cst_125 = arith.constant 0.000000e+00 : f32
    %340 = vector.broadcast %cst_125 : f32 to vector<16x17xf32>
    %341 = vector.extract_strided_slice %252 {offsets = [0, 17], sizes = [16, 239], strides = [1, 1]} : vector<16x256xf32> to vector<16x239xf32>
    %342 = tpu.concatenate %341, %340 in 1 : vector<16x239xf32>, vector<16x17xf32> -> vector<16x256xf32>
    %c1_i32_126 = arith.constant 1 : i32
    %343 = vector.broadcast %c1_i32_126 : i32 to vector<1x256xi32>
    %344 = arith.addi %2, %343 : vector<1x256xi32>
    %c0_i32_127 = arith.constant 0 : i32
    %345 = vector.broadcast %c0_i32_127 : i32 to vector<1x256xi32>
    %346 = arith.cmpi sge, %344, %345 : vector<1x256xi32>
    %c1_i32_128 = arith.constant 1 : i32
    %347 = vector.broadcast %c1_i32_128 : i32 to vector<1x256xi32>
    %348 = arith.addi %2, %347 : vector<1x256xi32>
    %c16_i32_129 = arith.constant 16 : i32
    %349 = vector.broadcast %c16_i32_129 : i32 to vector<1x256xi32>
    %350 = arith.cmpi slt, %348, %349 : vector<1x256xi32>
    %351 = arith.andi %346, %350 : vector<1x256xi1>
    %cst_130 = arith.constant 0.000000e+00 : f32
    %352 = vector.shape_cast %351 : vector<1x256xi1> to vector<1x256xi1>
    %353 = vector.broadcast %352 : vector<1x256xi1> to vector<16x256xi1>
    %354 = vector.broadcast %cst_130 : f32 to vector<16x256xf32>
    %355 = arith.select %353, %342, %354 : vector<16x256xi1>, vector<16x256xf32>
    %356 = tpu.concatenate %269, %272, %288, %304, %252, %320, %336, %339, %355 in 0 : vector<16x256xf32>, vector<16x256xf32>, vector<16x256xf32>, vector<16x256xf32>, vector<16x256xf32>, vector<16x256xf32>, vector<16x256xf32>, vector<16x256xf32>, vector<16x256xf32> -> vector<144x256xf32>
    %cst_131 = arith.constant dense<0.000000e+00> : vector<8x256xf32>
    %357 = tpu.matmul %253, %356, %cst_131 {dimension_numbers = #tpu.dot_dimension_numbers<[1], [0], [0], [1], [0, 0, 1, 1], [], []>} : vector<8x144xf32>, vector<144x256xf32>, vector<8x256xf32> -> vector<8x256xf32>
    %c0_132 = arith.constant 0 : index
    %c0_133 = arith.constant 0 : index
    %358 = vector.load %arg7[%c0_132, %c0_133] : memref<8x72xf32, #tpu.memory_space<vmem>>, vector<8x72xf32>
    %cst_134 = arith.constant 0.000000e+00 : f32
    %359 = vector.broadcast %cst_134 : f32 to vector<8x17xf32>
    %360 = vector.extract_strided_slice %114 {offsets = [0, 0], sizes = [8, 239], strides = [1, 1]} : vector<8x256xf32> to vector<8x239xf32>
    %361 = tpu.concatenate %359, %360 in 1 : vector<8x17xf32>, vector<8x239xf32> -> vector<8x256xf32>
    %c-1_i32_135 = arith.constant -1 : i32
    %362 = vector.broadcast %c-1_i32_135 : i32 to vector<1x256xi32>
    %363 = arith.addi %2, %362 : vector<1x256xi32>
    %c0_i32_136 = arith.constant 0 : i32
    %364 = vector.broadcast %c0_i32_136 : i32 to vector<1x256xi32>
    %365 = arith.cmpi sge, %363, %364 : vector<1x256xi32>
    %c-1_i32_137 = arith.constant -1 : i32
    %366 = vector.broadcast %c-1_i32_137 : i32 to vector<1x256xi32>
    %367 = arith.addi %2, %366 : vector<1x256xi32>
    %c16_i32_138 = arith.constant 16 : i32
    %368 = vector.broadcast %c16_i32_138 : i32 to vector<1x256xi32>
    %369 = arith.cmpi slt, %367, %368 : vector<1x256xi32>
    %370 = arith.andi %365, %369 : vector<1x256xi1>
    %cst_139 = arith.constant 0.000000e+00 : f32
    %371 = vector.shape_cast %370 : vector<1x256xi1> to vector<1x256xi1>
    %372 = vector.broadcast %371 : vector<1x256xi1> to vector<8x256xi1>
    %373 = vector.broadcast %cst_139 : f32 to vector<8x256xf32>
    %374 = arith.select %372, %361, %373 : vector<8x256xi1>, vector<8x256xf32>
    %cst_140 = arith.constant 0.000000e+00 : f32
    %375 = vector.broadcast %cst_140 : f32 to vector<8x16xf32>
    %376 = vector.extract_strided_slice %114 {offsets = [0, 0], sizes = [8, 240], strides = [1, 1]} : vector<8x256xf32> to vector<8x240xf32>
    %377 = tpu.concatenate %375, %376 in 1 : vector<8x16xf32>, vector<8x240xf32> -> vector<8x256xf32>
    %cst_141 = arith.constant 0.000000e+00 : f32
    %378 = vector.broadcast %cst_141 : f32 to vector<8x15xf32>
    %379 = vector.extract_strided_slice %114 {offsets = [0, 0], sizes = [8, 241], strides = [1, 1]} : vector<8x256xf32> to vector<8x241xf32>
    %380 = tpu.concatenate %378, %379 in 1 : vector<8x15xf32>, vector<8x241xf32> -> vector<8x256xf32>
    %c1_i32_142 = arith.constant 1 : i32
    %381 = vector.broadcast %c1_i32_142 : i32 to vector<1x256xi32>
    %382 = arith.addi %2, %381 : vector<1x256xi32>
    %c0_i32_143 = arith.constant 0 : i32
    %383 = vector.broadcast %c0_i32_143 : i32 to vector<1x256xi32>
    %384 = arith.cmpi sge, %382, %383 : vector<1x256xi32>
    %c1_i32_144 = arith.constant 1 : i32
    %385 = vector.broadcast %c1_i32_144 : i32 to vector<1x256xi32>
    %386 = arith.addi %2, %385 : vector<1x256xi32>
    %c16_i32_145 = arith.constant 16 : i32
    %387 = vector.broadcast %c16_i32_145 : i32 to vector<1x256xi32>
    %388 = arith.cmpi slt, %386, %387 : vector<1x256xi32>
    %389 = arith.andi %384, %388 : vector<1x256xi1>
    %cst_146 = arith.constant 0.000000e+00 : f32
    %390 = vector.shape_cast %389 : vector<1x256xi1> to vector<1x256xi1>
    %391 = vector.broadcast %390 : vector<1x256xi1> to vector<8x256xi1>
    %392 = vector.broadcast %cst_146 : f32 to vector<8x256xf32>
    %393 = arith.select %391, %380, %392 : vector<8x256xi1>, vector<8x256xf32>
    %cst_147 = arith.constant 0.000000e+00 : f32
    %394 = vector.broadcast %cst_147 : f32 to vector<8x1xf32>
    %395 = vector.extract_strided_slice %114 {offsets = [0, 0], sizes = [8, 255], strides = [1, 1]} : vector<8x256xf32> to vector<8x255xf32>
    %396 = tpu.concatenate %394, %395 in 1 : vector<8x1xf32>, vector<8x255xf32> -> vector<8x256xf32>
    %c-1_i32_148 = arith.constant -1 : i32
    %397 = vector.broadcast %c-1_i32_148 : i32 to vector<1x256xi32>
    %398 = arith.addi %2, %397 : vector<1x256xi32>
    %c0_i32_149 = arith.constant 0 : i32
    %399 = vector.broadcast %c0_i32_149 : i32 to vector<1x256xi32>
    %400 = arith.cmpi sge, %398, %399 : vector<1x256xi32>
    %c-1_i32_150 = arith.constant -1 : i32
    %401 = vector.broadcast %c-1_i32_150 : i32 to vector<1x256xi32>
    %402 = arith.addi %2, %401 : vector<1x256xi32>
    %c16_i32_151 = arith.constant 16 : i32
    %403 = vector.broadcast %c16_i32_151 : i32 to vector<1x256xi32>
    %404 = arith.cmpi slt, %402, %403 : vector<1x256xi32>
    %405 = arith.andi %400, %404 : vector<1x256xi1>
    %cst_152 = arith.constant 0.000000e+00 : f32
    %406 = vector.shape_cast %405 : vector<1x256xi1> to vector<1x256xi1>
    %407 = vector.broadcast %406 : vector<1x256xi1> to vector<8x256xi1>
    %408 = vector.broadcast %cst_152 : f32 to vector<8x256xf32>
    %409 = arith.select %407, %396, %408 : vector<8x256xi1>, vector<8x256xf32>
    %cst_153 = arith.constant 0.000000e+00 : f32
    %410 = vector.broadcast %cst_153 : f32 to vector<8x1xf32>
    %411 = vector.extract_strided_slice %114 {offsets = [0, 1], sizes = [8, 255], strides = [1, 1]} : vector<8x256xf32> to vector<8x255xf32>
    %412 = tpu.concatenate %411, %410 in 1 : vector<8x255xf32>, vector<8x1xf32> -> vector<8x256xf32>
    %c1_i32_154 = arith.constant 1 : i32
    %413 = vector.broadcast %c1_i32_154 : i32 to vector<1x256xi32>
    %414 = arith.addi %2, %413 : vector<1x256xi32>
    %c0_i32_155 = arith.constant 0 : i32
    %415 = vector.broadcast %c0_i32_155 : i32 to vector<1x256xi32>
    %416 = arith.cmpi sge, %414, %415 : vector<1x256xi32>
    %c1_i32_156 = arith.constant 1 : i32
    %417 = vector.broadcast %c1_i32_156 : i32 to vector<1x256xi32>
    %418 = arith.addi %2, %417 : vector<1x256xi32>
    %c16_i32_157 = arith.constant 16 : i32
    %419 = vector.broadcast %c16_i32_157 : i32 to vector<1x256xi32>
    %420 = arith.cmpi slt, %418, %419 : vector<1x256xi32>
    %421 = arith.andi %416, %420 : vector<1x256xi1>
    %cst_158 = arith.constant 0.000000e+00 : f32
    %422 = vector.shape_cast %421 : vector<1x256xi1> to vector<1x256xi1>
    %423 = vector.broadcast %422 : vector<1x256xi1> to vector<8x256xi1>
    %424 = vector.broadcast %cst_158 : f32 to vector<8x256xf32>
    %425 = arith.select %423, %412, %424 : vector<8x256xi1>, vector<8x256xf32>
    %cst_159 = arith.constant 0.000000e+00 : f32
    %426 = vector.broadcast %cst_159 : f32 to vector<8x15xf32>
    %427 = vector.extract_strided_slice %114 {offsets = [0, 15], sizes = [8, 241], strides = [1, 1]} : vector<8x256xf32> to vector<8x241xf32>
    %428 = tpu.concatenate %427, %426 in 1 : vector<8x241xf32>, vector<8x15xf32> -> vector<8x256xf32>
    %c-1_i32_160 = arith.constant -1 : i32
    %429 = vector.broadcast %c-1_i32_160 : i32 to vector<1x256xi32>
    %430 = arith.addi %2, %429 : vector<1x256xi32>
    %c0_i32_161 = arith.constant 0 : i32
    %431 = vector.broadcast %c0_i32_161 : i32 to vector<1x256xi32>
    %432 = arith.cmpi sge, %430, %431 : vector<1x256xi32>
    %c-1_i32_162 = arith.constant -1 : i32
    %433 = vector.broadcast %c-1_i32_162 : i32 to vector<1x256xi32>
    %434 = arith.addi %2, %433 : vector<1x256xi32>
    %c16_i32_163 = arith.constant 16 : i32
    %435 = vector.broadcast %c16_i32_163 : i32 to vector<1x256xi32>
    %436 = arith.cmpi slt, %434, %435 : vector<1x256xi32>
    %437 = arith.andi %432, %436 : vector<1x256xi1>
    %cst_164 = arith.constant 0.000000e+00 : f32
    %438 = vector.shape_cast %437 : vector<1x256xi1> to vector<1x256xi1>
    %439 = vector.broadcast %438 : vector<1x256xi1> to vector<8x256xi1>
    %440 = vector.broadcast %cst_164 : f32 to vector<8x256xf32>
    %441 = arith.select %439, %428, %440 : vector<8x256xi1>, vector<8x256xf32>
    %cst_165 = arith.constant 0.000000e+00 : f32
    %442 = vector.broadcast %cst_165 : f32 to vector<8x16xf32>
    %443 = vector.extract_strided_slice %114 {offsets = [0, 16], sizes = [8, 240], strides = [1, 1]} : vector<8x256xf32> to vector<8x240xf32>
    %444 = tpu.concatenate %443, %442 in 1 : vector<8x240xf32>, vector<8x16xf32> -> vector<8x256xf32>
    %cst_166 = arith.constant 0.000000e+00 : f32
    %445 = vector.broadcast %cst_166 : f32 to vector<8x17xf32>
    %446 = vector.extract_strided_slice %114 {offsets = [0, 17], sizes = [8, 239], strides = [1, 1]} : vector<8x256xf32> to vector<8x239xf32>
    %447 = tpu.concatenate %446, %445 in 1 : vector<8x239xf32>, vector<8x17xf32> -> vector<8x256xf32>
    %c1_i32_167 = arith.constant 1 : i32
    %448 = vector.broadcast %c1_i32_167 : i32 to vector<1x256xi32>
    %449 = arith.addi %2, %448 : vector<1x256xi32>
    %c0_i32_168 = arith.constant 0 : i32
    %450 = vector.broadcast %c0_i32_168 : i32 to vector<1x256xi32>
    %451 = arith.cmpi sge, %449, %450 : vector<1x256xi32>
    %c1_i32_169 = arith.constant 1 : i32
    %452 = vector.broadcast %c1_i32_169 : i32 to vector<1x256xi32>
    %453 = arith.addi %2, %452 : vector<1x256xi32>
    %c16_i32_170 = arith.constant 16 : i32
    %454 = vector.broadcast %c16_i32_170 : i32 to vector<1x256xi32>
    %455 = arith.cmpi slt, %453, %454 : vector<1x256xi32>
    %456 = arith.andi %451, %455 : vector<1x256xi1>
    %cst_171 = arith.constant 0.000000e+00 : f32
    %457 = vector.shape_cast %456 : vector<1x256xi1> to vector<1x256xi1>
    %458 = vector.broadcast %457 : vector<1x256xi1> to vector<8x256xi1>
    %459 = vector.broadcast %cst_171 : f32 to vector<8x256xf32>
    %460 = arith.select %458, %447, %459 : vector<8x256xi1>, vector<8x256xf32>
    %461 = tpu.concatenate %374, %377, %393, %409, %114, %425, %441, %444, %460 in 0 : vector<8x256xf32>, vector<8x256xf32>, vector<8x256xf32>, vector<8x256xf32>, vector<8x256xf32>, vector<8x256xf32>, vector<8x256xf32>, vector<8x256xf32>, vector<8x256xf32> -> vector<72x256xf32>
    %cst_172 = arith.constant dense<0.000000e+00> : vector<8x256xf32>
    %462 = tpu.matmul %358, %461, %cst_172 {dimension_numbers = #tpu.dot_dimension_numbers<[1], [0], [0], [1], [0, 0, 1, 1], [], []>} : vector<8x72xf32>, vector<72x256xf32>, vector<8x256xf32> -> vector<8x256xf32>
    %463 = arith.addf %357, %462 : vector<8x256xf32>
    %c0_173 = arith.constant 0 : index
    %c0_174 = arith.constant 0 : index
    %464 = vector.load %arg8[%c0_173, %c0_174] : memref<8x1xf32, #tpu.memory_space<vmem>>, vector<8x1xf32>
    %465 = vector.broadcast %464 : vector<8x1xf32> to vector<8x256xf32>
    %466 = arith.addf %463, %465 : vector<8x256xf32>
    %cst_175 = arith.constant 0.000000e+00 : f32
    %467 = vector.broadcast %cst_175 : f32 to vector<8x256xf32>
    %468 = arith.maximumf %466, %467 : vector<8x256xf32>
    %c0_176 = arith.constant 0 : index
    %c0_177 = arith.constant 0 : index
    %469 = vector.load %arg9[%c0_176, %c0_177] : memref<3x8xf32, #tpu.memory_space<vmem>>, vector<3x8xf32>
    %cst_178 = arith.constant dense<0.000000e+00> : vector<3x256xf32>
    %470 = tpu.matmul %469, %468, %cst_178 {dimension_numbers = #tpu.dot_dimension_numbers<[1], [0], [0], [1], [0, 0, 1, 1], [], []>} : vector<3x8xf32>, vector<8x256xf32>, vector<3x256xf32> -> vector<3x256xf32>
    %c0_179 = arith.constant 0 : index
    %c0_180 = arith.constant 0 : index
    %471 = vector.load %arg10[%c0_179, %c0_180] : memref<3x1xf32, #tpu.memory_space<vmem>>, vector<3x1xf32>
    %472 = vector.broadcast %471 : vector<3x1xf32> to vector<3x256xf32>
    %473 = arith.addf %470, %472 : vector<3x256xf32>
    %474 = vector.shape_cast %473 : vector<3x256xf32> to vector<1x3x256xf32>
    %cst_181 = arith.constant dense<0.000000e+00> : vector<1xf32>
    %475 = vector.multi_reduction <add>, %474, %cst_181 [1, 2] : vector<1x3x256xf32> to vector<1xf32>
    %476 = vector.shape_cast %475 : vector<1xf32> to vector<1x1x1xf32>
    %477 = vector.extract %476[0, 0, 0] : f32 from vector<1x1x1xf32>
    %cst_182 = arith.constant 7.680000e+02 : f32
    %478 = arith.divf %477, %cst_182 : f32
    %479 = vector.broadcast %478 : f32 to vector<3x256xf32>
    %480 = arith.subf %473, %479 : vector<3x256xf32>
    %481 = arith.mulf %480, %480 : vector<3x256xf32>
    %482 = vector.shape_cast %481 : vector<3x256xf32> to vector<1x3x256xf32>
    %cst_183 = arith.constant dense<0.000000e+00> : vector<1xf32>
    %483 = vector.multi_reduction <add>, %482, %cst_183 [1, 2] : vector<1x3x256xf32> to vector<1xf32>
    %484 = vector.shape_cast %483 : vector<1xf32> to vector<1x1x1xf32>
    %485 = vector.extract %484[0, 0, 0] : f32 from vector<1x1x1xf32>
    %cst_184 = arith.constant 7.680000e+02 : f32
    %486 = arith.divf %485, %cst_184 : f32
    %cst_185 = arith.constant 9.99999974E-6 : f32
    %487 = arith.addf %486, %cst_185 : f32
    %488 = math.rsqrt %487 : f32
    %489 = vector.broadcast %488 : f32 to vector<3x256xf32>
    %490 = arith.mulf %480, %489 : vector<3x256xf32>
    %c0_186 = arith.constant 0 : index
    %c0_187 = arith.constant 0 : index
    %491 = vector.load %arg11[%c0_186, %c0_187] : memref<3x256xf32, #tpu.memory_space<vmem>>, vector<3x256xf32>
    %492 = arith.mulf %490, %491 : vector<3x256xf32>
    %c0_188 = arith.constant 0 : index
    %c0_189 = arith.constant 0 : index
    %493 = vector.load %arg12[%c0_188, %c0_189] : memref<3x256xf32, #tpu.memory_space<vmem>>, vector<3x256xf32>
    %494 = arith.addf %492, %493 : vector<3x256xf32>
    %cst_190 = arith.constant 0.000000e+00 : f32
    %495 = vector.broadcast %cst_190 : f32 to vector<3x256xf32>
    %496 = arith.subf %495, %494 : vector<3x256xf32>
    %497 = math.exp %496 : vector<3x256xf32>
    %cst_191 = arith.constant 1.000000e+00 : f32
    %498 = vector.broadcast %cst_191 : f32 to vector<3x256xf32>
    %499 = arith.addf %498, %497 : vector<3x256xf32>
    %cst_192 = arith.constant 1.000000e+00 : f32
    %500 = vector.broadcast %cst_192 : f32 to vector<3x256xf32>
    %501 = arith.divf %500, %499 : vector<3x256xf32>
    %c0_193 = arith.constant 0 : index
    %c0_194 = arith.constant 0 : index
    %c0_195 = arith.constant 0 : index
    %502 = vector.load %arg13[%c0_193, %c0_194, %c0_195] : memref<1x3x256xf32, #tpu.memory_space<vmem>>, vector<1x3x256xf32>
    %503 = vector.shape_cast %502 : vector<1x3x256xf32> to vector<3x256xf32>
    %504 = vector.shape_cast %501 : vector<3x256xf32> to vector<1x3x256xf32>
    tpu.vector_store %arg13[%c0_193, %c0_194, %c0_195], %504 {strides = array<i32>} : memref<1x3x256xf32, #tpu.memory_space<vmem>>, vector<1x3x256xf32>,
    return
  }
  func.func @transform_0(%arg0: i32) -> (i32, i32, i32) {
    %c0_i32 = arith.constant 0 : i32
    %c0_i32_0 = arith.constant 0 : i32
    %c0_i32_1 = arith.constant 0 : i32
    return %arg0, %c0_i32, %c0_i32_0 : i32, i32, i32
  }
  func.func @transform_1(%arg0: i32) -> (i32, i32) {
    %c0_i32 = arith.constant 0 : i32
    %c0_i32_0 = arith.constant 0 : i32
    %c0_i32_1 = arith.constant 0 : i32
    return %c0_i32, %c0_i32_0 : i32, i32
  }
  func.func @transform_2(%arg0: i32) -> (i32, i32) {
    %c0_i32 = arith.constant 0 : i32
    %c0_i32_0 = arith.constant 0 : i32
    %c0_i32_1 = arith.constant 0 : i32
    return %c0_i32, %c0_i32_0 : i32, i32
  }
  func.func @transform_3(%arg0: i32) -> (i32, i32) {
    %c0_i32 = arith.constant 0 : i32
    %c0_i32_0 = arith.constant 0 : i32
    %c0_i32_1 = arith.constant 0 : i32
    return %c0_i32, %c0_i32_0 : i32, i32
  }
  func.func @transform_4(%arg0: i32) -> (i32, i32) {
    %c0_i32 = arith.constant 0 : i32
    %c0_i32_0 = arith.constant 0 : i32
    %c0_i32_1 = arith.constant 0 : i32
    return %c0_i32, %c0_i32_0 : i32, i32
  }
  func.func @transform_5(%arg0: i32) -> (i32, i32) {
    %c0_i32 = arith.constant 0 : i32
    %c0_i32_0 = arith.constant 0 : i32
    %c0_i32_1 = arith.constant 0 : i32
    return %c0_i32, %c0_i32_0 : i32, i32
  }
  func.func @transform_6(%arg0: i32) -> (i32, i32) {
    %c0_i32 = arith.constant 0 : i32
    %c0_i32_0 = arith.constant 0 : i32
    %c0_i32_1 = arith.constant 0 : i32
    return %c0_i32, %c0_i32_0 : i32, i32
  }
  func.func @transform_7(%arg0: i32) -> (i32, i32) {
    %c0_i32 = arith.constant 0 : i32
    %c0_i32_0 = arith.constant 0 : i32
    %c0_i32_1 = arith.constant 0 : i32
    return %c0_i32, %c0_i32_0 : i32, i32
  }
  func.func @transform_8(%arg0: i32) -> (i32, i32) {
    %c0_i32 = arith.constant 0 : i32
    %c0_i32_0 = arith.constant 0 : i32
    %c0_i32_1 = arith.constant 0 : i32
    return %c0_i32, %c0_i32_0 : i32, i32
  }
  func.func @transform_9(%arg0: i32) -> (i32, i32) {
    %c0_i32 = arith.constant 0 : i32
    %c0_i32_0 = arith.constant 0 : i32
    %c0_i32_1 = arith.constant 0 : i32
    return %c0_i32, %c0_i32_0 : i32, i32
  }
  func.func @transform_10(%arg0: i32) -> (i32, i32) {
    %c0_i32 = arith.constant 0 : i32
    %c0_i32_0 = arith.constant 0 : i32
    %c0_i32_1 = arith.constant 0 : i32
    return %c0_i32, %c0_i32_0 : i32, i32
  }
  func.func @transform_11(%arg0: i32) -> (i32, i32) {
    %c0_i32 = arith.constant 0 : i32
    %c0_i32_0 = arith.constant 0 : i32
    %c0_i32_1 = arith.constant 0 : i32
    return %c0_i32, %c0_i32_0 : i32, i32
  }
  func.func @transform_12(%arg0: i32) -> (i32, i32, i32) {
    %c0_i32 = arith.constant 0 : i32
    %c0_i32_0 = arith.constant 0 : i32
    %c0_i32_1 = arith.constant 0 : i32
    return %arg0, %c0_i32, %c0_i32_0 : i32, i32, i32
  }
}

</mosaic_0001>

<bundles_post_ra>
// kernel: tpu_custom_call.1
= control target key start
LH: loop header
LB: loop body
LE: loop exit
PB: predicated region body
PF: predicated region fallthrough
CT: control target
= control target key end

     0   :  { %17 = vsyncpa [#allocation3], 0  ;;  %s2588_s0 = inlined_call_operand.vmem [shape: f32[2,4,256], index: 0, kind: input, shape index: {}]   ;;  %s2589_s1 = inlined_call_operand.hbm [shape: f32[8,36], index: 1, kind: input, shape index: {}]   ;;  %s2590_s2 = inlined_call_operand.vmem [shape: f32[8,1], index: 2, kind: input, shape index: {}]   ;;  %s2591_s3 = inlined_call_operand.vmem [shape: f32[16,72], index: 3, kind: input, shape index: {}]   ;;  %s2592_s4 = inlined_call_operand.vmem [shape: f32[16,1], index: 4, kind: input, shape index: {}]   ;;  %s2593_s5 = inlined_call_operand.hbm [shape: f32[8,144], index: 5, kind: input, shape index: {}]   ;;  %s2594_s6 = inlined_call_operand.hbm [shape: f32[8,72], index: 6, kind: input, shape index: {}]   ;;  %s2595_s7 = inlined_call_operand.vmem [shape: f32[8,1], index: 7, kind: input, shape index: {}]   ;;  %s2596_s8 = inlined_call_operand.vmem [shape: f32[3,8], index: 8, kind: input, shape index: {}]   ;;  %s2597_s9 = inlined_call_operand.vmem [shape: f32[3,1], index: 9, kind: input, shape index: {}]   ;;  %s2598_s10 = inlined_call_operand.vmem [shape: f32[3,256], index: 10, kind: input, shape index: {}]   ;;  %s2599_s11 = inlined_call_operand.hbm [shape: f32[3,256], index: 11, kind: input, shape index: {}]   ;;  %s2600_s12 = inlined_call_operand.vmem [shape: f32[2,3,256], index: 12, kind: output, shape index: {}]  }
   0x1   :  { %18 = vsyncpa [#allocation5], 0 }
   0x2   :  { %19 = vsyncpa [#allocation8], 0  ;;  %s2021_s21 = smov 0  }
   0x3 LB: > { %s346_s24 = sshll.u32 %s2593_s5, 4  ;;  %s2030_s25 = sadd.s32 4294967295, %s1932_s21   ;;  %s1932_s21 = sphi %s2021_s21, %s25_s21   ;;  %s347_s24 = int_to_ptr.hbm [resolvable:$true] %s346_s24 }
   0x4   : > { %p1576_p0 = scmp.ge.s32.totalorder %s1932_s21, 1  ;;  %p313_p1 = scmp.lt.s32.totalorder %s1932_s21, 3 }
   0x5   : > { %p1706_p2 = scmp.eq.s32.totalorder %s2030_s25, 0  ;;  %s1934_s27 = smov [#allocation4]  }
   0x6   : > { %p2035_p3 = pnand %p1576_p0, %p313_p1  ;;  %s348_s28 = sshll.u32 %s1934_s27, 4  ;;  %s349_s28 = int_to_ptr.vmem [resolvable:$true] %s348_s28 }
   0x7   : > { %s325_s13 = sshll.u32 %s2589_s1, 4  ;;  %s358_s16 = sshll.u32 %s2594_s6, 4  ;;  %s326_s13 = int_to_ptr.hbm [resolvable:$true] %s325_s13  ;;  %s359_s16 = int_to_ptr.hbm [resolvable:$true] %s358_s16 }
   0x8   : > { %p1693_p4 = pneg %p2035_p3  ;;  %s1935_s18 = smov [#allocation2]  }
   0x9   : > { %s327_s19 = sshll.u32 %s1935_s18, 4  ;;  %s1936_s20 = smov [#allocation6]   ;;  %s328_s19 = int_to_ptr.vmem [resolvable:$true] %s327_s19 }
   0xa   : > { %p2049_p5 = pnand %p1706_p2, %p1693_p4  ;;  %s360_s22 = sshll.u32 %s1936_s20, 4  ;;  %s361_s22 = int_to_ptr.vmem [resolvable:$true] %s360_s22 }
   0xb   : > { %s382_s29 = sshll.u32 %s2599_s11, 4  ;;  %s1937_s30 = smov [#allocation7]   ;;  %s383_s29 = int_to_ptr.hbm [resolvable:$true] %s382_s29 }
   0xc   : > { %1699 = dma.hbm_to_vmem [thread:$0]  (!%p2049_p5), %s347_s24, 256, %s349_s28, [#allocation5]  }
   0xd   : > { %1696 = dma.hbm_to_vmem [thread:$0]  (!%p2049_p5), %s326_s13, 128, %s328_s19, [#allocation3]  }
   0xe   : > { %1702 = dma.hbm_to_vmem [thread:$0]  (!%p2049_p5), %s359_s16, 128, %s361_s22, [#allocation5]  }
   0xf   : > { %s384_s14 = sshll.u32 %s1937_s30, 4  ;;  %405 = sbr.rel (%p2035_p3) target bundleno = 1867 (0x74b), region = 68  ;;  %s385_s14 = int_to_ptr.vmem [resolvable:$true] %s384_s14 }
  0x10   : > { %1705 = dma.hbm_to_vmem [thread:$0]  (!%p2049_p5), %s383_s29, 128, %s385_s14, [#allocation8]  }
  0x14   : > { %1919 = dma.done.wait (%p1706_p2), [#allocation3], 128  }
  0x15   : > { %1921 = vsyncadd (%p1706_p2), [#allocation3], 4294967168 }
  0x16   : > { %1923 = dma.done.wait (%p1706_p2), [#allocation5], 384  }
  0x17   : > { %1925 = vsyncadd (%p1706_p2), [#allocation5], 4294966912 }
  0x18   : > { %1927 = dma.done.wait (%p1706_p2), [#allocation8], 128  }
  0x19   : > { %1929 = vsyncadd (%p1706_p2), [#allocation8], 4294967168  ;;  %p463_p6 = scmp.lt.s32.totalorder %s2030_s25, 1  ;;  %s1938_s15 = smov 127   ;;  %v473_v22 = vlaneseq  ;;  %v647_v32 = vld [vmem:[%s2590_s2] sm:$0xff]  ;;  %vm565_vm0 = vcmask 1039360  }
  0x1a   : > { %s1939_s16 = smov 1   ;;  %s1940_s17 = smov 113   ;;  %v1946_v34 = vmov 0   ;;  %vm593_vm1 = vcmask 916480   ;;  %vm579_vm2 = vcmask 924672   ;;  %vm604_vm5 = vcmask 908288  }
  0x1b   : > { %s2636_s25 = smov (!%p463_p6, %s2030_s25), 1  ;;  %s1941_s18 = smov 112   ;;  %v2099_v23 = vand.u32 127, %v473_v22  ;;  %1769 = vset.pattern.permute.xlu2 %v1946_v34  ;;  %1771 = vset.pattern.permute.xlu1 %v1946_v34  ;;  %vm2602_vm8 = vcmask 1043456   ;;  %vm2606_vm9 = vcmask 7168   ;;  %vm2604_vm10 = vcmask 130048  }
  0x1c   : > { %s2601_s24 = sshll.u32 %s2636_s25, 3  ;;  %s1942_s19 = smov 17   ;;  %1770 = vset.pattern.permute.xlu0 %v1946_v34  ;;  %vm2603_vm11 = vcmask 138240   ;;  %vm2605_vm12 = vcmask 121856   ;;  %vm653_vm13 = vcmask 293888  }
  0x1d   : > { %s467_s13 = scalar_lea.vmem %s2588_s0, %s2601_s24  ;;  %s1943_s20 = smov 111   ;;  %v2104_v25 = vadd.s32 128, %v2099_v23  ;;  %v2110_v29 = vand.u32 15, %v2099_v23 }
  0x1e   : > { %v478_v0 = vld [vmem:[%s467_s13] sm:$0xff]  ;;  %s1944_s22 = smov 16   ;;  %s1945_s23 = smov 15  }
  0x1f   : > { %481 = vst [vmem:[#allocation1] ss:$2 sm:$0xff] %v478_v0  ;;  %v2107_v26 = vand.u32 15, %v2104_v25  ;;  %v2122_v38 = vadd.s32 1, %v2110_v29  ;;  %v2125_v41 = vadd.s32 4294967295, %v2110_v29  ;;  %s1947_s30 = smov 94  }
  0x20   : > { %s1948_s14 = smov 96   ;;  %s1949_s26 = smov 98  }
  0x21   : > { %v2113_v30 = vadd.s32 1, %v2107_v26  ;;  %v2119_v33 = vadd.s32 4294967295, %v2107_v26  ;;  %vm534_vm6 = vcmp.lt.s32.totalorder %v2122_v38, 16  ;;  %vm495_vm7 = vcmp.ge.s32.totalorder %v2125_v41, 0  ;;  %s1950_s28 = smov 126   ;;  %s1951_s13 = smov 2  }
  0x22   : > { %s1952_s27 = smov 30   ;;  %s1953_s29 = smov 32  }
  0x23   : > { %vm535_vm3 = vcmp.lt.s32.totalorder %v2113_v30, 16  ;;  %vm496_vm4 = vcmp.ge.s32.totalorder %v2119_v33, 0 }
  0x26   : > { %v482_v1 = vld.sshfl [vmem:[#allocation1] sm:$0xff pattern:$0x75316420]  ;;  %v483_v2 = vld.sshfl [vmem:[#allocation1 + $0x8] sm:$0xff pattern:$0x75316420] }
  0x27   : > { %507 = vst [vmem:[#allocation1] ss:$2 sm:$0xff] %v478_v0 }
  0x2e   : > { %v508_v3 = vld.sshfl [vmem:[#allocation1] sm:$0xff pattern:$0x75316420]  ;;  %v509_v4 = vld.sshfl [vmem:[#allocation1 + $0x8] sm:$0xff pattern:$0x75316420] }
  0x2f   : > { %518 = vst [vmem:[#allocation1] ss:$2 sm:$0xff] %v478_v0 }
  0x36   : > { %v519_v5 = vld.sshfl [vmem:[#allocation1] sm:$0xff pattern:$0x75316420]  ;;  %v520_v6 = vld.sshfl [vmem:[#allocation1 + $0x8] sm:$0xff pattern:$0x75316420] }
  0x37   : > { %544 = vst [vmem:[#allocation1] ss:$2 sm:$0xff] %v478_v0  ;;  %v1764_v21 = vpack.i.bf16 %v520_v6, %v519_v5 }
  0x3e   : > { %v545_v7 = vld.sshfl [vmem:[#allocation1] sm:$0xff pattern:$0x75316420]  ;;  %v546_v8 = vld.sshfl [vmem:[#allocation1 + $0x8] sm:$0xff pattern:$0x75316420] }
  0x3f   : > { %558 = vst [vmem:[#allocation1] ss:$2 sm:$0xff] %v478_v0  ;;  %v1744_v12 = vpack.i.bf16 %v546_v8, %v545_v7 }
  0x41   : > { %1745 = vrot.lane.b32.xlu2 %v1744_v12, %s1939_s16 }
  0x46   : > { %v559_v9 = vld.sshfl [vmem:[#allocation1] sm:$0xff pattern:$0x75316420]  ;;  %v560_v10 = vld.sshfl [vmem:[#allocation1 + $0x8] sm:$0xff pattern:$0x75316420] }
  0x47   : > { %v1749_v11 = vpack.i.bf16 %v560_v10, %v559_v9  ;;  %572 = vst [vmem:[#allocation1] ss:$2 sm:$0xff] %v478_v0 }
  0x49   : > { %1750 = vrot.lane.b32.xlu1 %v1749_v11, %s1938_s15 }
  0x4e   : > { %v573_v13 = vld.sshfl [vmem:[#allocation1] sm:$0xff pattern:$0x75316420]  ;;  %v574_v14 = vld.sshfl [vmem:[#allocation1 + $0x8] sm:$0xff pattern:$0x75316420] }
  0x4f   : > { %586 = vst [vmem:[#allocation1] ss:$2 sm:$0xff] %v478_v0  ;;  %v1754_v15 = vpack.i.bf16 %v574_v14, %v573_v13 }
  0x51   : > { %1755 = vrot.lane.b32.xlu2 %v1754_v15, %s1940_s17 }
  0x56   : > { %v587_v16 = vld.sshfl [vmem:[#allocation1] sm:$0xff pattern:$0x75316420]  ;;  %v588_v17 = vld.sshfl [vmem:[#allocation1 + $0x8] sm:$0xff pattern:$0x75316420] }
  0x57   : > { %v1759_v18 = vpack.i.bf16 %v588_v17, %v587_v16  ;;  %597 = vst [vmem:[#allocation1] ss:$2 sm:$0xff] %v478_v0 }
  0x59   : > { %1760 = vrot.lane.b32.xlu0 %v1759_v18, %s1941_s18  ;;  %484 = vrot.lane.b32.xlu2 %v482_v1, %s1942_s19 }
  0x5e   : > { %v599_v19 = vld.sshfl [vmem:[#allocation1 + $0x8] sm:$0xff pattern:$0x75316420]  ;;  %v598_v20 = vld.sshfl [vmem:[#allocation1] sm:$0xff pattern:$0x75316420] }
  0x5f   : > { %602 = vrot.lane.b32.xlu1 %v599_v19, %s1943_s20  ;;  %622 = vst [vmem:[#allocation1] ss:$2 sm:$0xff] %v478_v0 }
  0x61   : > { %600 = vrot.lane.b32.xlu0 %v598_v20, %s1943_s20  ;;  %650 = vperm.xlu2 %1769, %v647_v32  }
  0x66   : > { %v624_v63 = vld.sshfl [vmem:[#allocation1 + $0x8] sm:$0xff pattern:$0x75316420] }
  0x67   : > { %510 = vrot.lane.b32.xlu1 %v508_v3, %s1944_s22  ;;  %v623_v3 = vld.sshfl [vmem:[#allocation1] sm:$0xff pattern:$0x75316420] }
  0x69   : > { %1765 = vrot.lane.b32.xlu0 %v1764_v21, %s1945_s23 }
  0x6f   : > { %486 = vrot.lane.b32.xlu1 %v483_v2, %s1942_s19 }
  0x71   : > { %512 = vrot.lane.b32.xlu0 %v509_v4, %s1944_s22 }
  0x9b   : > { %v2101_v24 = vpop.permute.xlu2 %1745 }
  0x9c   : > { %v1748_v59 = vunpack.i.h.bf16 %v2101_v24  ;;  %v1747_v60 = vunpack.i.l.bf16 %v2101_v24 }
  0x9e   : > { %v555_v7 = vsel %vm2606_vm9, 0.0, %v1747_v60  ;;  %v552_v8 = vsel %vm2606_vm9, %v1747_v60, %v1748_v59 }
  0x9f   : > { %v556_v13 = vsel %vm495_vm7, %v555_v7, 0.0  ;;  %v557_v15 = vsel %vm496_vm4, %v552_v8, 0.0 }
  0xa0   : > { %v618_v21 = vrot.slane %v556_v13, 4  ;;  %v619_v24 = vrot.slane %v557_v15, 4  ;;  %v877_v15 = vld [vmem:[%s2592_s4] sm:$0xff] }
  0xab   : > { %v1756_v28 = vpop.permute.xlu2 %1755 }
  0xac   : > { %v1758_v37 = vunpack.i.h.bf16 %v1756_v28  ;;  %v1757_v43 = vunpack.i.l.bf16 %v1756_v28 }
  0xae   : > { %v583_v45 = vsel %vm579_vm2, %v1758_v37, 0.0  ;;  %v580_v51 = vsel %vm579_vm2, %v1757_v43, %v1758_v37 }
  0xaf   : > { %v585_v53 = vsel %vm496_vm4, %v583_v45, 0.0  ;;  %v584_v62 = vsel %vm495_vm7, %v580_v51, 0.0 }
  0xb3   : > { %v485_v6 = vpop.permute.xlu2 %484 }
  0xb4   : > { %v492_v12 = vsel %vm2603_vm11, 0.0, %v485_v6 }
  0xb5   : > { %v505_v19 = vsel %vm495_vm7, %v492_v12, 0.0 }
  0xbb   : > { %v1751_v27 = vpop.permute.xlu1 %1750  ;;  %v651_v45 = vpop.permute.xlu2 %650 }
  0xbc   : > { %v1753_v31 = vunpack.i.h.bf16 %v1751_v27  ;;  %v1752_v35 = vunpack.i.l.bf16 %v1751_v27 }
  0xbe   : > { %v569_v42 = vsel %vm565_vm0, %v1753_v31, 0.0  ;;  %v566_v46 = vsel %vm565_vm0, %v1752_v35, %v1753_v31 }
  0xbf   : > { %v571_v47 = vsel %vm535_vm3, %v569_v42, 0.0  ;;  %v570_v54 = vsel %vm534_vm6, %v566_v46, 0.0 }
  0xc0   : > { %v630_v58 = vrot.slane %v571_v47, 4  ;;  %v629_v2 = vrot.slane %v570_v54, 4  ;;  %v705_v54 = vand.u32 16, %v2099_v23 }
  0xc2   : > { %v644_v5 = vsel %vm2602_vm8, %v624_v63, %v630_v58  ;;  %v643_v10 = vsel %vm2602_vm8, %v623_v3, %v629_v2  ;;  %vm707_vm15 = vcmp.ne.s32.totalorder %v705_v54, 0  ;;  %v735_v3 = vand.u32 1, %v2099_v23 }
  0xcb   : > { %v1761_v36 = vpop.permute.xlu0 %1760 }
  0xcc   : > { %v1763_v39 = vunpack.i.h.bf16 %v1761_v36  ;;  %v1762_v40 = vunpack.i.l.bf16 %v1761_v36  ;;  %v479_v36 = vld [vmem:[#allocation2] sm:$0xff] }
  0xce   : > { %v596_v44 = vsel %vm593_vm1, %v1763_v39, 0.0  ;;  %v594_v48 = vsel %vm593_vm1, %v1762_v40, %v1763_v39 }
  0xcf   : > { %v635_v49 = vrot.slane %v596_v44, 4  ;;  %v634_v57 = vrot.slane %v594_v48, 4 }
  0xd1   : > { %v603_v50 = vpop.permute.xlu1 %602  ;;  %v646_v1 = vsel %vm2602_vm8, %v585_v53, %v635_v49  ;;  %v645_v4 = vsel %vm2602_vm8, %v584_v62, %v634_v57  ;;  %v706_v53 = vand.u32 16, %v2104_v25 }
  0xd2   : > { %v608_v52 = vsel %vm604_vm5, %v603_v50, 0.0 }
  0xd3   : > { %v601_v55 = vpop.permute.xlu0 %600  ;;  %v610_v56 = vsel %vm535_vm3, %v608_v52, 0.0  ;;  %vm708_vm14 = vcmp.ne.s32.totalorder %v706_v53, 0 }
  0xd4   : > { %1593 = vmatpush.msk.msra.mxu1 %vm2602_vm8, %v610_v56  ;;  %v605_v61 = vsel %vm604_vm5, %v601_v55, %v603_v50 }
  0xd5   : > { %v609_v0 = vsel %vm534_vm6, %v605_v61, 0.0 }
  0xd6   : > { %1591 = vmatpush.msk.msra.mxu3 %vm2602_vm8, %v609_v0  ;;  %695 = vmatpush.msra.mxu1 %v646_v1 }
  0xd8   : > { %675 = vmatpush.msra.mxu3 %v645_v4  ;;  %696 = vmatpush.msra.mxu1 %v644_v5  ;;  %v736_v4 = vand.u32 1, %v2104_v25  ;;  %v878_v25 = vld [vmem:[%s2592_s4 + $0x8] sm:$0xff] }
  0xd9   : > { %v511_v9 = vpop.permute.xlu1 %510 }
  0xda   : > { %v517_v11 = vsel %vm2604_vm10, 0.0, %v511_v9  ;;  %676 = vmatpush.msra.mxu3 %v643_v10 }
  0xdb   : > { %v1766_v14 = vpop.permute.xlu0 %1765  ;;  %v612_v16 = vrot.slane %v517_v11, 4 }
  0xdc   : > { %v1768_v17 = vunpack.i.h.bf16 %v1766_v14  ;;  %v1767_v18 = vunpack.i.l.bf16 %v1766_v14 }
  0xdd   : > { %v639_v34 = vsel %vm2602_vm8, %v505_v19, %v612_v16  ;;  %v810_v19 = vadd.s32 2, %v2110_v29 }
  0xde   : > { %v529_v20 = vsel %vm2605_vm12, 0.0, %v1767_v18  ;;  %v526_v22 = vsel %vm2605_vm12, %v1767_v18, %v1768_v17 }
  0xdf   : > { %v542_v27 = vsel %vm534_vm6, %v529_v20, 0.0  ;;  %v543_v28 = vsel %vm535_vm3, %v526_v22, 0.0  ;;  %v811_v20 = vadd.s32 2, %v2107_v26 }
  0xe0   : > { %v641_v31 = vsel %vm2602_vm8, %v542_v27, %v618_v21  ;;  %v642_v32 = vsel %vm2602_vm8, %v543_v28, %v619_v24 }
  0xe1   : > { %v487_v35 = vpop.permute.xlu1 %486  ;;  %677 = vmatpush.msra.mxu3 %v641_v31  ;;  %697 = vmatpush.msra.mxu1 %v642_v32  ;;  %v778_v32 = vadd.s32 4294967294, %v2110_v29 }
  0xe2   : > { %v489_v37 = vsel %vm2603_vm11, %v485_v6, %v487_v35  ;;  %vm850_vm11 = vcmask 801792  }
  0xe3   : > { %v513_v39 = vpop.permute.xlu0 %512  ;;  %678 = vmatpush.msra.mxu3 %v639_v34  ;;  %v506_v43 = vsel %vm496_vm4, %v489_v37, 0.0  ;;  %v779_v34 = vadd.s32 4294967294, %v2107_v26 }
  0xe4   : > { %v515_v40 = vsel %vm2604_vm10, %v511_v9, %v513_v39  ;;  %1592 = vmatmul.msk.f32.vlgmr.msra.gmra.mxu3 %vm653_vm13, %v479_v36 }
  0xe5   : > { %v613_v42 = vrot.slane %v515_v40, 4  ;;  %vm781_vm12 = vcmp.ge.s32.totalorder %v779_v34, 0 }
  0xe7   : > { %v640_v44 = vsel %vm2602_vm8, %v506_v43, %v613_v42  ;;  %vm861_vm8 = vcmask 785408  }
  0xe8   : > { %698 = vmatpush.msra.mxu1 %v640_v44 }
  0xe9   : > { %1594 = vmatmul.msk.f32.vlgmr.msra.gmra.mxu1 %vm653_vm13, %v479_v36  ;;  %vm737_vm13 = vcmp.ne.s32.totalorder %v735_v3, 0  ;;  %v766_v3 = vld [vmem:[%s2591_s3 + $0x8] sm:$0xff] }
 0x166   : > { %v700_v46 = vpop.f32.mrf.mxu1 }
 0x167   : > { %v680_v47 = vpop.f32.mrf.mxu3  ;;  %v701_v48 = vadd.f32 %v700_v46, %v651_v45 }
 0x168   : > { %v681_v49 = vadd.f32 %v680_v47, %v651_v45 }
 0x169   : > { %v2183_v50 = vmax.f32 %v701_v48, 0.0 }
 0x16a   : > { %v2185_v51 = vmax.f32 %v681_v49, 0.0 }
 0x16b   : > { %713 = vrot.lane.b32.xlu1 %v2183_v50, %s1944_s22 }
 0x16c   : > { %719 = vrot.lane.b32.xlu2 %v2185_v51, %s1941_s18  ;;  %711 = vrot.lane.b32.xlu0 %v2185_v51, %s1944_s22 }
 0x174   : > { %721 = vrot.lane.b32.xlu0 %v2183_v50, %s1941_s18 }
 0x1c6   : > { %v720_v56 = vpop.permute.xlu2 %719 }
 0x1dd   : > { %v714_v55 = vpop.permute.xlu1 %713 }
 0x1de   : > { %v2195_v52 = vpop.permute.xlu0 %711 }
 0x1df   : > { %v2203_v58 = vsel %vm2604_vm10, %v2195_v52, %v714_v55  ;;  %v718_v59 = vsel %vm2604_vm10, 0.0, %v2195_v52  ;;  %vm780_vm10 = vcmp.ge.s32.totalorder %v778_v32, 0 }
 0x1e6   : > { %v2199_v57 = vpop.permute.xlu0 %721 }
 0x1e7   : > { %v2209_v60 = vsel %vm593_vm1, %v720_v56, %v2199_v57  ;;  %v726_v61 = vsel %vm593_vm1, %v2199_v57, 0.0 }
 0x1e8   : > { %v732_v62 = vsel %vm708_vm14, %v2203_v58, %v726_v61  ;;  %v731_v63 = vsel %vm707_vm15, %v718_v59, %v2209_v60  ;;  %vm738_vm14 = vcmp.ne.s32.totalorder %v736_v4, 0  ;;  %vm870_vm15 = vcmask 769024   ;;  %v765_v61 = vld [vmem:[%s2591_s3] sm:$0xff] }
 0x1e9   : > { %v734_v0 = vmax.f32 %v2183_v50, %v732_v62  ;;  %v733_v1 = vmax.f32 %v2185_v51, %v731_v63 }
 0x1eb   : > { %743 = vrot.lane.b32.xlu2 %v734_v0, %s1939_s16  ;;  %749 = vrot.lane.b32.xlu0 %v733_v1, %s1938_s15 }
 0x1ec   : > { %741 = vrot.lane.b32.xlu1 %v733_v1, %s1939_s16 }
 0x1f4   : > { %751 = vrot.lane.b32.xlu1 %v734_v0, %s1938_s15 }
 0x245   : > { %v744_v5 = vpop.permute.xlu2 %743 }
 0x25d   : > { %v750_v6 = vpop.permute.xlu0 %749 }
 0x25e   : > { %v742_v2 = vpop.permute.xlu1 %741 }
 0x25f   : > { %v745_v8 = vsel %vm2606_vm9, %v742_v2, %v744_v5  ;;  %v748_v9 = vsel %vm2606_vm9, 0.0, %v742_v2  ;;  %vm796_vm9 = vcmask 261120  }
 0x266   : > { %v752_v7 = vpop.permute.xlu1 %751 }
 0x267   : > { %v753_v10 = vsel %vm565_vm0, %v750_v6, %v752_v7  ;;  %v756_v11 = vsel %vm565_vm0, %v752_v7, 0.0 }
 0x268   : > { %v761_v12 = vsel %vm737_vm13, %v748_v9, %v753_v10  ;;  %v762_v13 = vsel %vm738_vm14, %v745_v8, %v756_v11  ;;  %vm814_vm13 = vcmp.lt.s32.totalorder %v810_v19, 16  ;;  %vm815_vm14 = vcmp.lt.s32.totalorder %v811_v20, 16 }
 0x269   : > { %v2227_v14 = vmax.f32 %v733_v1, %v761_v12  ;;  %v2229_v23 = vmax.f32 %v734_v0, %v762_v13 }
 0x26b   : > { %868 = vrot.lane.b32.xlu0 %v2229_v23, %s1947_s30  ;;  %857 = vrot.lane.b32.xlu1 %v2227_v14, %s1948_s14 }
 0x26c   : > { %866 = vrot.lane.b32.xlu2 %v2227_v14, %s1947_s30  ;;  %s1954_s30 = smov 34  }
 0x273   : > { %846 = vrot.lane.b32.xlu0 %v2227_v14, %s1949_s26  ;;  %848 = vrot.lane.b32.xlu1 %v2229_v23, %s1949_s26 }
 0x274   : > { %859 = vrot.lane.b32.xlu2 %v2229_v23, %s1948_s14 }
 0x27b   : > { %837 = vrot.lane.b32.xlu0 %v2229_v23, %s1950_s28  ;;  %824 = vrot.lane.b32.xlu1 %v2227_v14, %s1951_s13 }
 0x27c   : > { %835 = vrot.lane.b32.xlu2 %v2227_v14, %s1950_s28 }
 0x283   : > { %801 = vrot.lane.b32.xlu0 %v2227_v14, %s1952_s27  ;;  %803 = vrot.lane.b32.xlu1 %v2229_v23, %s1952_s27 }
 0x284   : > { %826 = vrot.lane.b32.xlu2 %v2229_v23, %s1951_s13 }
 0x28b   : > { %794 = vrot.lane.b32.xlu0 %v2229_v23, %s1953_s29  ;;  %769 = vrot.lane.b32.xlu1 %v2227_v14, %s1954_s30 }
 0x28c   : > { %792 = vrot.lane.b32.xlu2 %v2227_v14, %s1953_s29  ;;  %s2633_s29 = sshll.u32 %s2636_s25, 3 }
 0x293   : > { %886 = vperm.xlu0 %1770, %v878_v25   ;;  %881 = vperm.xlu1 %1771, %v877_v15  }
 0x294   : > { %771 = vrot.lane.b32.xlu2 %v2229_v23, %s1954_s30 }
 0x29b   : > { %1147 = vrot.lane.b32.xlu0 %v2183_v50, %s1940_s17  ;;  %1155 = vrot.lane.b32.xlu1 %v2185_v51, %s1943_s20 }
 0x29c   : > { %1157 = vrot.lane.b32.xlu2 %v2183_v50, %s1943_s20 }
 0x2a3   : > { %1115 = vrot.lane.b32.xlu0 %v2185_v51, %s1945_s23  ;;  %1135 = vrot.lane.b32.xlu1 %v2185_v51, %s1938_s15 }
 0x2a4   : > { %1145 = vrot.lane.b32.xlu2 %v2185_v51, %s1940_s17 }
 0x2ab   : > { %1125 = vrot.lane.b32.xlu1 %v2185_v51, %s1939_s16 }
 0x2ac   : > { %1137 = vrot.lane.b32.xlu2 %v2183_v50, %s1938_s15 }
 0x2b3   : > { %1127 = vrot.lane.b32.xlu1 %v2183_v50, %s1939_s16 }
 0x2c6   : > { %v867_v16 = vpop.permute.xlu2 %866 }
 0x2ce   : > { %v860_v17 = vpop.permute.xlu2 %859 }
 0x2d6   : > { %v836_v18 = vpop.permute.xlu2 %835 }
 0x2dd   : > { %v869_v21 = vpop.permute.xlu0 %868  ;;  %v858_v22 = vpop.permute.xlu1 %857 }
 0x2de   : > { %v827_v24 = vpop.permute.xlu2 %826  ;;  %v871_v27 = vsel %vm870_vm15, %v867_v16, %v869_v21  ;;  %v874_v28 = vsel %vm870_vm15, %v869_v21, 0.0  ;;  %v862_v31 = vsel %vm861_vm8, %v858_v22, %v860_v17  ;;  %vm839_vm15 = vcmask 1031168  }
 0x2df   : > { %1595 = vmatpush.msk.msra.mxu2 %vm814_vm13, %v871_v27  ;;  %1605 = vmatpush.msk.msrb.mxu3 %vm815_vm14, %v874_v28 }
 0x2e1   : > { %904 = vmatpush.msra.mxu2 %v862_v31  ;;  %1606 = vmatpush.msk.msrb.mxu3 %vm861_vm8, %v860_v17  ;;  %vm828_vm8 = vcmask 15360  }
 0x2e5   : > { %v847_v35 = vpop.permute.xlu0 %846  ;;  %v849_v36 = vpop.permute.xlu1 %848 }
 0x2e6   : > { %v793_v37 = vpop.permute.xlu2 %792  ;;  %v851_v39 = vsel %vm850_vm11, %v847_v35, %v849_v36  ;;  %v854_v40 = vsel %vm850_vm11, %v849_v36, 0.0  ;;  %vm805_vm11 = vcmask 244736   ;;  %v1302_v35 = vld [vmem:[%s2597_s9] sm:$0x7] }
 0x2e7   : > { %1596 = vmatpush.msk.msra.mxu2 %vm780_vm10, %v851_v39  ;;  %1607 = vmatpush.msk.msrb.mxu3 %vm781_vm12, %v854_v40  ;;  %v1291_v36 = vld [vmem:[%s2595_s7] sm:$0xff] }
 0x2ed   : > { %v838_v42 = vpop.permute.xlu0 %837  ;;  %v825_v43 = vpop.permute.xlu1 %824 }
 0x2ee   : > { %v772_v29 = vpop.permute.xlu2 %771  ;;  %v840_v44 = vsel %vm839_vm15, %v836_v18, %v838_v42  ;;  %v843_v26 = vsel %vm839_vm15, %v838_v42, 0.0  ;;  %v832_v45 = vsel %vm828_vm8, 0.0, %v825_v43  ;;  %v829_v46 = vsel %vm828_vm8, %v825_v43, %v827_v24  ;;  %vm1600_vm15 = vmneg %vm796_vm9 }
 0x2ef   : > { %1597 = vmatpush.msk.msra.mxu2 %vm814_vm13, %v840_v44  ;;  %1608 = vmatpush.msk.msrb.mxu3 %vm815_vm14, %v843_v26  ;;  %vm773_vm8 = vcmask 277504  }
 0x2f1   : > { %907 = vmatpush.msra.mxu2 %v2227_v14  ;;  %930 = vmatpush.msrb.mxu3 %v2229_v23 }
 0x2f3   : > { %1598 = vmatpush.msk.msra.mxu2 %vm780_vm10, %v832_v45  ;;  %1609 = vmatpush.msk.msrb.mxu3 %vm781_vm12, %v829_v46 }
 0x2f5   : > { %v802_v47 = vpop.permute.xlu0 %801  ;;  %v804_v48 = vpop.permute.xlu1 %803 }
 0x2f6   : > { %v1158_v49 = vpop.permute.xlu2 %1157  ;;  %v809_v53 = vsel %vm805_vm11, 0.0, %v802_v47  ;;  %v806_v54 = vsel %vm805_vm11, %v802_v47, %v804_v48  ;;  %vm889_vm11 = vcmask 588800  }
 0x2f7   : > { %1599 = vmatpush.msk.msra.mxu2 %vm814_vm13, %v809_v53  ;;  %1610 = vmatpush.msk.msrb.mxu3 %vm815_vm14, %v806_v54  ;;  %v1162_v55 = vsel %vm604_vm5, %v1158_v49, 0.0 }
 0x2f8   : > { %1623 = vmatpush.msk.msrb.mxu1 %vm535_vm3, %v1162_v55 }
 0x2f9   : > { %1601 = vmatpush.msk.msra.mxu2 %vm1600_vm15, %v793_v37 }
 0x2fa   : > { %1624 = vmatpush.msk.msrb.mxu1 %vm593_vm1, %v2199_v57 }
 0x2fd   : > { %v795_v56 = vpop.permute.xlu0 %794  ;;  %v770_v59 = vpop.permute.xlu1 %769 }
 0x2fe   : > { %v777_v62 = vsel %vm773_vm8, 0.0, %v770_v59  ;;  %v797_v63 = vsel %vm796_vm9, %v793_v37, %v795_v56  ;;  %v774_v0 = vsel %vm773_vm8, %v770_v59, %v772_v29  ;;  %v1146_v57 = vpop.permute.xlu2 %1145  ;;  %vm2609_vm9 = vcmask 7168  }
 0x2ff   : > { %1602 = vmatpush.msk.msra.mxu2 %vm780_vm10, %v777_v62  ;;  %933 = vmatpush.msrb.mxu3 %v797_v63  ;;  %vm2610_vm10 = vcmask 121856   ;;  %vm2614_vm14 = vmmov %vm2609_vm9 }
 0x300   : > { %1603 = vmatmul.msk.f32.vlgmr.msra.gmra.mxu2 %vm889_vm11, %v765_v61  ;;  %vm2615_vm15 = vmmov %vm2610_vm10 }
 0x301   : > { %1611 = vmatpush.msk.msrb.mxu3 %vm781_vm12, %v774_v0  ;;  %vm2611_vm12 = vcmask 130048   ;;  %vm2616_vm8 = vmmov %vm2609_vm9 }
 0x302   : > { %1612 = vmatmul.msk.f32.vlgmr.msrb.gmra.mxu3 %vm889_vm11, %v765_v61  ;;  %vm2332_vm13 = vmneg %vm2611_vm12 }
 0x303   : > { %vm2618_vm12 = vmmov %vm2610_vm10 }
 0x305   : > { %v887_v1 = vpop.permute.xlu0 %886  ;;  %v882_v2 = vpop.permute.xlu1 %881 }
 0x306   : > { %v1138_v4 = vpop.permute.xlu2 %1137 }
 0x307   : > { %v1142_v9 = vsel %vm565_vm0, %v1138_v4, 0.0 }
 0x308   : > { %1604 = vmatmul.msk.f32.gmra.mxu2 %vm889_vm11, %v766_v3 }
 0x30a   : > { %1613 = vmatmul.msk.f32.gmra.mxu3 %vm889_vm11, %v766_v3 }
 0x30d   : > { %v1148_v5 = vpop.permute.xlu0 %1147  ;;  %v1156_v6 = vpop.permute.xlu1 %1155 }
 0x30e   : > { %v1159_v7 = vsel %vm604_vm5, %v1156_v6, %v1158_v49  ;;  %v1152_v8 = vsel %vm579_vm2, %v1148_v5, 0.0  ;;  %v1149_v10 = vsel %vm579_vm2, %v1146_v57, %v1148_v5 }
 0x30f   : > { %1614 = vmatpush.msk.msra.mxu0 %vm534_vm6, %v1159_v7  ;;  %1625 = vmatpush.msk.msrb.mxu1 %vm496_vm4, %v1152_v8 }
 0x311   : > { %1176 = vmatpush.msra.mxu0 %v2209_v60  ;;  %1626 = vmatpush.msk.msrb.mxu1 %vm535_vm3, %v1142_v9 }
 0x313   : > { %1615 = vmatpush.msk.msra.mxu0 %vm495_vm7, %v1149_v10  ;;  %1199 = vmatpush.msrb.mxu1 %v2183_v50 }
 0x315   : > { %v1136_v11 = vpop.permute.xlu1 %1135  ;;  %v2324_v13 = vpop.permute.xlu0 %1115 }
 0x316   : > { %v1139_v12 = vsel %vm565_vm0, %v1136_v11, %v1138_v4  ;;  %v1122_v23 = vsel %vm2610_vm10, 0.0, %v2324_v13 }
 0x317   : > { %1616 = vmatpush.msk.msra.mxu0 %vm534_vm6, %v1139_v12 }
 0x319   : > { %1179 = vmatpush.msra.mxu0 %v2185_v51 }
 0x31d   : > { %v1126_v60 = vpop.permute.xlu1 %1125 }
 0x31e   : > { %v1132_v14 = vsel %vm2609_vm9, 0.0, %v1126_v60  ;;  %vm2617_vm9 = vmmov %vm2616_vm8 }
 0x31f   : > { %1617 = vmatpush.msk.msra.mxu0 %vm495_vm7, %v1132_v14 }
 0x321   : > { %1618 = vmatpush.msk.msra.mxu0 %vm534_vm6, %v1122_v23 }
 0x323   : > { %1620 = vmatpush.msk.msra.mxu0 %vm2332_vm13, %v2195_v52 }
 0x325   : > { %v1128_v15 = vpop.permute.xlu1 %1127 }
 0x326   : > { %v1129_v16 = vsel %vm2614_vm14, %v1126_v60, %v1128_v15  ;;  %v947_v60 = vld [vmem:[#allocation4 + $0x8] sm:$0xff]  ;;  %vm2619_vm14 = vcmask 130048  }
 0x327   : > { %1627 = vmatpush.msk.msrb.mxu1 %vm496_vm4, %v1129_v16 }
 0x383   : > { %v913_v20 = vpop.f32.mrf.mxu2 }
 0x384   : > { %v914_v52 = vadd.f32 %v913_v20, %v882_v2  ;;  %v946_v20 = vld [vmem:[#allocation4] sm:$0xff] }
 0x385   : > { %v936_v17 = vpop.f32.mrf.mxu3 }
 0x386   : > { %v937_v18 = vadd.f32 %v936_v17, %v882_v2  ;;  %v2352_v21 = vmax.f32 %v914_v52, 0.0 }
 0x388   : > { %v2344_v19 = vmax.f32 %v937_v18, 0.0  ;;  %v1104_v18 = vld [vmem:[#allocation6] sm:$0xff] }
 0x38a   : > { %1030 = vrot.lane.b32.xlu1 %v2344_v19, %s1938_s15  ;;  %1050 = vrot.lane.b32.xlu0 %v2344_v19, %s1940_s17 }
 0x38b   : > { %1070 = vrot.lane.b32.xlu2 %v2344_v19, %s1941_s18  ;;  %v916_v22 = vpop.f32.mrf.mxu2 }
 0x38c   : > { %v917_v24 = vadd.f32 %v916_v22, %v887_v1 }
 0x38d   : > { %v939_v27 = vpop.f32.mrf.mxu3 }
 0x38e   : > { %v940_v28 = vadd.f32 %v939_v27, %v887_v1  ;;  %v2366_v31 = vmax.f32 %v917_v24, 0.0 }
 0x390   : > { %v2368_v32 = vmax.f32 %v940_v28, 0.0  ;;  %v1772_v34 = vpack.i.bf16 %v2352_v21, %v2366_v31 }
 0x392   : > { %988 = vrot.lane.b32.xlu1 %v2352_v21, %s1945_s23  ;;  %1028 = vrot.lane.b32.xlu0 %v2352_v21, %s1938_s15 }
 0x393   : > { %1048 = vrot.lane.b32.xlu2 %v2352_v21, %s1940_s17 }
 0x39a   : > { %972 = vrot.lane.b32.xlu1 %v2352_v21, %s1944_s22  ;;  %1008 = vrot.lane.b32.xlu0 %v2352_v21, %s1939_s16 }
 0x39b   : > { %952 = vrot.lane.b32.xlu2 %v2352_v21, %s1942_s19 }
 0x3a2   : > { %1074 = vrot.lane.b32.xlu1 %v2368_v32, %s1941_s18  ;;  %1010 = vrot.lane.b32.xlu0 %v2344_v19, %s1939_s16 }
 0x3a3   : > { %1773 = vrot.lane.b32.xlu2 %v1772_v34, %s1941_s18  ;;  %s472_s18 = scalar_lea.vmem %s2600_s12, %s2633_s29 }
 0x3aa   : > { %1054 = vrot.lane.b32.xlu1 %v2368_v32, %s1940_s17  ;;  %1084 = vrot.lane.b32.xlu0 %v2352_v21, %s1943_s20 }
 0x3ab   : > { %1117 = vrot.lane.b32.xlu2 %v2183_v50, %s1945_s23 }
 0x3b2   : > { %1032 = vrot.lane.b32.xlu1 %v2366_v31, %s1938_s15  ;;  %1052 = vrot.lane.b32.xlu0 %v2366_v31, %s1940_s17 }
 0x3b3   : > { %1034 = vrot.lane.b32.xlu2 %v2368_v32, %s1938_s15 }
 0x3ba   : > { %1086 = vrot.lane.b32.xlu1 %v2344_v19, %s1943_s20  ;;  %990 = vrot.lane.b32.xlu0 %v2344_v19, %s1945_s23 }
 0x3bb   : > { %1012 = vrot.lane.b32.xlu2 %v2366_v31, %s1939_s16 }
 0x3c2   : > { %1088 = vrot.lane.b32.xlu1 %v2366_v31, %s1943_s20  ;;  %992 = vrot.lane.b32.xlu0 %v2366_v31, %s1945_s23 }
 0x3c3   : > { %956 = vrot.lane.b32.xlu2 %v2366_v31, %s1942_s19 }
 0x3ca   : > { %1105 = vrot.lane.b32.xlu1 %v2185_v51, %s1942_s19  ;;  %976 = vrot.lane.b32.xlu0 %v2366_v31, %s1944_s22  ;;  %v1777_v51 = vpack.i.bf16 %v2344_v19, %v2368_v32 }
 0x3cb   : > { %1090 = vrot.lane.b32.xlu2 %v2368_v32, %s1943_s20 }
 0x3d2   : > { %958 = vrot.lane.b32.xlu1 %v2368_v32, %s1942_s19  ;;  %1014 = vrot.lane.b32.xlu0 %v2368_v32, %s1939_s16 }
 0x3d3   : > { %994 = vrot.lane.b32.xlu2 %v2368_v32, %s1945_s23 }
 0x3da   : > { %1305 = vperm.xlu1 %1771, %v1302_v35   ;;  %1107 = vrot.lane.b32.xlu0 %v2183_v50, %s1942_s19 }
 0x3db   : > { %1778 = vrot.lane.b32.xlu2 %v1777_v51, %s1944_s22 }
 0x3e2   : > { %1294 = vperm.xlu0 %1770, %v1291_v36  }
 0x3e3   : > { %954 = vrot.lane.b32.xlu2 %v2344_v19, %s1942_s19 }
 0x3e5   : > { %v2426_v37 = vpop.permute.xlu2 %1070 }
 0x3ed   : > { %v1049_v39 = vpop.permute.xlu2 %1048 }
 0x3f5   : > { %v2428_v40 = vpop.permute.xlu2 %952 }
 0x3fc   : > { %v2430_v42 = vpop.permute.xlu1 %1030  ;;  %v2432_v43 = vpop.permute.xlu0 %1050 }
 0x3fd   : > { %v1774_v50 = vpop.permute.xlu2 %1773  ;;  %v1056_v1 = vsel %vm579_vm2, %v1049_v39, %v2432_v43  ;;  %v1062_v22 = vsel %vm579_vm2, %v2432_v43, 0.0  ;;  %v1042_v41 = vsel %vm565_vm0, %v2430_v42, 0.0 }
 0x3fe   : > { %v1776_v48 = vunpack.i.h.bf16 %v1774_v50  ;;  %v1775_v49 = vunpack.i.l.bf16 %v1774_v50 }
 0x400   : > { %v1076_v59 = vsel %vm593_vm1, %v1776_v48, %v2426_v37 }
 0x404   : > { %v2434_v29 = vpop.permute.xlu1 %988  ;;  %v1029_v44 = vpop.permute.xlu0 %1028 }
 0x405   : > { %v1118_v26 = vpop.permute.xlu2 %1117  ;;  %v1036_v4 = vsel %vm565_vm0, %v1029_v44, %v2430_v42  ;;  %v1002_v23 = vsel %vm2618_vm12, 0.0, %v2434_v29 }
 0x406   : > { %v1119_v45 = vsel %vm2615_vm15, %v2324_v13, %v1118_v26  ;;  %vm2620_vm15 = vcmask 138240  }
 0x407   : > { %1628 = vmatpush.msk.msrb.mxu1 %vm535_vm3, %v1119_v45 }
 0x409   : > { %1202 = vmatpush.msrb.mxu1 %v2203_v58 }
 0x40c   : > { %v2441_v46 = vpop.permute.xlu1 %972  ;;  %v2443_v47 = vpop.permute.xlu0 %1008 }
 0x40d   : > { %v1035_v55 = vpop.permute.xlu2 %1034  ;;  %v1022_v9 = vsel %vm2617_vm9, 0.0, %v2443_v47 }
 0x40e   : > { %v1043_v27 = vsel %vm565_vm0, %v1035_v55, 0.0 }
 0x414   : > { %v1075_v53 = vpop.permute.xlu1 %1074  ;;  %v2445_v54 = vpop.permute.xlu0 %1010 }
 0x415   : > { %v1077_v56 = vsel %vm593_vm1, %v1775_v49, %v1075_v53  ;;  %v2450_v58 = vpop.permute.xlu2 %1012 }
 0x416   : > { %1211 = vmatpush.msrb.mxu2 %v1077_v56  ;;  %v1023_v7 = vsel %vm2616_vm8, 0.0, %v2450_v58  ;;  %v1301_v56 = vld [vmem:[%s2596_s8] sm:$0x7] }
 0x418   : > { %1212 = vmatpush.msrb.mxu2 %v1076_v59 }
 0x41c   : > { %v1055_v61 = vpop.permute.xlu1 %1054  ;;  %v1085_v62 = vpop.permute.xlu0 %1084 }
 0x41d   : > { %v2459_v2 = vpop.permute.xlu2 %956  ;;  %v1063_v25 = vsel %vm579_vm2, %v1055_v61, 0.0 }
 0x424   : > { %v1033_v63 = vpop.permute.xlu1 %1032  ;;  %v1053_v0 = vpop.permute.xlu0 %1052 }
 0x425   : > { %v1057_v57 = vsel %vm579_vm2, %v1053_v0, %v1055_v61  ;;  %v1037_v3 = vsel %vm565_vm0, %v1033_v63, %v1035_v55  ;;  %v1091_v8 = vpop.permute.xlu2 %1090  ;;  %vm2624_vm2 = vmmov %vm2617_vm9 }
 0x426   : > { %1631 = vmatpush.msk.msrb.mxu2 %vm495_vm7, %v1057_v57  ;;  %v1099_v34 = vsel %vm604_vm5, %v1091_v8, 0.0  ;;  %vm2625_vm0 = vmmov %vm2624_vm2 }
 0x428   : > { %1632 = vmatpush.msk.msrb.mxu2 %vm495_vm7, %v1056_v1 }
 0x42a   : > { %1633 = vmatpush.msk.msrb.mxu2 %vm534_vm6, %v1037_v3 }
 0x42c   : > { %v1087_v5 = vpop.permute.xlu1 %1086  ;;  %v2466_v6 = vpop.permute.xlu0 %990  ;;  %1634 = vmatpush.msk.msrb.mxu2 %vm534_vm6, %v1036_v4 }
 0x42d   : > { %v1092_v14 = vsel %vm604_vm5, %v1085_v62, %v1087_v5  ;;  %v995_v24 = vpop.permute.xlu2 %994 }
 0x42e   : > { %1217 = vmatpush.msrb.mxu2 %v2366_v31 }
 0x430   : > { %1218 = vmatpush.msrb.mxu2 %v2352_v21 }
 0x432   : > { %1635 = vmatpush.msk.msrb.mxu2 %vm495_vm7, %v1023_v7  ;;  %v1955_v7 = vmov 768.0  }
 0x433   : > { %1782 = vrcp.f32 %v1955_v7 }
 0x434   : > { %v1089_v10 = vpop.permute.xlu1 %1088  ;;  %v993_v11 = vpop.permute.xlu0 %992  ;;  %1636 = vmatpush.msk.msrb.mxu2 %vm495_vm7, %v1022_v9 }
 0x435   : > { %v1093_v12 = vsel %vm604_vm5, %v1089_v10, %v1091_v8  ;;  %v1003_v13 = vsel %vm2610_vm10, 0.0, %v993_v11  ;;  %v1779_v51 = vpop.permute.xlu2 %1778 }
 0x436   : > { %1637 = vmatpush.msk.msrb.mxu2 %vm534_vm6, %v1003_v13  ;;  %1645 = vmatpush.msk.msra.mxu3 %vm534_vm6, %v1093_v12  ;;  %v1780_v39 = vunpack.i.l.bf16 %v1779_v51 }
 0x438   : > { %1638 = vmatpush.msk.msrb.mxu2 %vm534_vm6, %v1002_v23  ;;  %1646 = vmatpush.msk.msra.mxu3 %vm534_vm6, %v1092_v14  ;;  %vm2621_vm6 = vmmov %vm2620_vm15 }
 0x439   : > { %1647 = vmatmul.msk.f32.vlgmr.msra.gmra.mxu3 %vm2619_vm14, %v947_v60  ;;  %v967_v38 = vsel %vm2621_vm6, 0.0, %v2459_v2  ;;  %vm2622_vm8 = vmmov %vm2621_vm6  ;;  %v1783_v8 = vpop.eup %1782 }
 0x43a   : > { %v966_v52 = vsel %vm2622_vm8, 0.0, %v2428_v40  ;;  %v1366_v9 = vmul.f32 768.0, %v1783_v8 }
 0x43c   : > { %v1106_v15 = vpop.permute.xlu1 %1105  ;;  %v977_v16 = vpop.permute.xlu0 %976  ;;  %v1367_v10 = vsub.f32 1.0, %v1366_v9 }
 0x43d   : > { %1640 = vmatpush.msk.msrb.mxu2 %vm2332_vm13, %v977_v16  ;;  %v1112_v17 = vsel %vm2620_vm15, 0.0, %v1106_v15  ;;  %v955_v26 = vpop.permute.xlu2 %954 }
 0x43e   : > { %1621 = vmatpush.msk.msra.mxu0 %vm495_vm7, %v1112_v17 }
 0x43f   : > { %1642 = vmatpush.msk.msrb.mxu2 %vm2332_vm13, %v2441_v46  ;;  %1622 = vmatmul.msk.f32.vlgmr.msra.gmra.mxu0 %vm889_vm11, %v1104_v18 }
 0x440   : > { %1648 = vmatpush.msk.msrb.mxu0 %vm593_vm1, %v1075_v53 }
 0x441   : > { %1643 = vmatpush.msk.msrb.mxu2 %vm495_vm7, %v967_v38 }
 0x442   : > { %1649 = vmatpush.msk.msrb.mxu0 %vm593_vm1, %v2426_v37  ;;  %vm2623_vm1 = vmmov %vm2621_vm6  ;;  %v1781_v37 = vunpack.i.h.bf16 %v1779_v51 }
 0x443   : > { %1644 = vmatpush.msk.msrb.mxu2 %vm495_vm7, %v966_v52  ;;  %vm2626_vm7 = vmmov %vm2610_vm10 }
 0x444   : > { %1650 = vmatpush.msk.msrb.mxu0 %vm496_vm4, %v1063_v25  ;;  %v1015_v21 = vpop.permute.xlu0 %1014  ;;  %1227 = vmatmul.f32.vlgmr.msrb.gmra.mxu2 %v946_v20  ;;  %v997_v36 = vsel %vm2626_vm7, %v993_v11, %v995_v24  ;;  %v959_v50 = vpop.permute.xlu1 %958  ;;  %vm2631_vm10 = vmmov %vm2623_vm1 }
 0x445   : > { %v1017_v35 = vsel %vm2624_vm2, %v2450_v58, %v1015_v21  ;;  %v961_v45 = vsel %vm2631_vm10, %v2459_v2, %v959_v50  ;;  %vm2632_vm12 = vmmov %vm2623_vm1  ;;  %vm2634_vm10 = vcmask 1043456  }
 0x446   : > { %1651 = vmatpush.msk.msrb.mxu0 %vm496_vm4, %v1062_v22  ;;  %v960_v30 = vsel %vm2632_vm12, %v2428_v40, %v955_v26  ;;  %v1416_v26 = vld [vmem:[%s2598_s10] sm:$0x77] }
 0x447   : > { %1418 = vst [vmem:[#allocation1] ss:$2 sm:$0xff] %v1416_v26 }
 0x448   : > { %1652 = vmatpush.msk.msrb.mxu0 %vm535_vm3, %v1043_v27 }
 0x44a   : > { %1653 = vmatpush.msk.msrb.mxu0 %vm535_vm3, %v1042_v41 }
 0x44c   : > { %1257 = vmatpush.msrb.mxu0 %v2368_v32  ;;  %v1108_v28 = vpop.permute.xlu0 %1107  ;;  %v1098_v32 = vsel %vm604_vm5, %v1087_v5, 0.0  ;;  %vm2627_vm5 = vmmov %vm2626_vm7  ;;  %v1306_v57 = vpop.permute.xlu1 %1305 }
 0x44d   : > { %v1109_v31 = vsel %vm2623_vm1, %v1106_v15, %v1108_v28  ;;  %v996_v42 = vsel %vm2627_vm5, %v2434_v29, %v2466_v6 }
 0x44e   : > { %1258 = vmatpush.msrb.mxu0 %v2344_v19  ;;  %1629 = vmatpush.msk.msrb.mxu1 %vm496_vm4, %v1109_v31  ;;  %v1016_v19 = vsel %vm2625_vm0, %v2443_v47, %v2445_v54 }
 0x44f   : > { %1630 = vmatmul.msk.f32.vlgmr.msrb.gmra.mxu1 %vm889_vm11, %v1104_v18  ;;  %vm2628_vm11 = vmmov %vm2619_vm14  ;;  %vm1370_vm14 = vweird.f32 %v1783_v8 }
 0x450   : > { %1654 = vmatpush.msk.msrb.mxu0 %vm496_vm4, %v1017_v35  ;;  %1660 = vmatpush.msk.msra.mxu1 %vm535_vm3, %v1099_v34  ;;  %v981_v43 = vsel %vm2628_vm11, %v977_v16, %v1780_v39  ;;  %vm2629_vm13 = vmmov %vm2628_vm11 }
 0x451   : > { %v980_v44 = vsel %vm2629_vm13, %v2441_v46, %v1781_v37  ;;  %vm2630_vm9 = vmmov %vm2628_vm11 }
 0x452   : > { %1655 = vmatpush.msk.msrb.mxu0 %vm496_vm4, %v1016_v19  ;;  %1661 = vmatpush.msk.msra.mxu1 %vm535_vm3, %v1098_v32 }
 0x454   : > { %1656 = vmatpush.msk.msrb.mxu0 %vm535_vm3, %v997_v36  ;;  %v1295_v53 = vpop.permute.xlu0 %1294 }
 0x456   : > { %1657 = vmatpush.msk.msrb.mxu0 %vm535_vm3, %v996_v42  ;;  %vm1308_vm3 = vcmask 64512  }
 0x457   : > { %1662 = vmatmul.msk.f32.vlgmr.msra.gmra.mxu1 %vm2630_vm9, %v947_v60  ;;  %v1368_v60 = vmul.f32 %v1783_v8, %v1367_v10 }
 0x458   : > { %1263 = vmatpush.msrb.mxu0 %v981_v43 }
 0x459   : > { %v1369_v15 = vadd.f32 %v1783_v8, %v1368_v60 }
 0x45a   : > { %1264 = vmatpush.msrb.mxu0 %v980_v44 }
 0x45b   : > { %v1371_v18 = vsel %vm1370_vm14, %v1783_v8, %v1369_v15 }
 0x45c   : > { %1658 = vmatpush.msk.msrb.mxu0 %vm496_vm4, %v961_v45  ;;  %v1425_v45 = vld [vmem:[#allocation7] sm:$0x77] }
 0x45e   : > { %1659 = vmatpush.msk.msrb.mxu0 %vm496_vm4, %v960_v30  ;;  %vm1352_vm4 = vcmask 1042432   ;;  %v1419_v30 = vld.sshfl [vmem:[#allocation1] sm:$0xff pattern:$0x75316420] }
 0x45f   : > { %1267 = vmatmul.f32.vlgmr.msrb.gmra.mxu0 %v946_v20 }
 0x4bc   : > { %v1185_v29 = vpop.f32.mrf.mxu0  ;;  %v1248_v46 = vpop.f32.mrf.mxu3 }
 0x4c7   : > { %v1228_v47 = vpop.f32.mrf.mxu2 }
 0x4c8   : > { %v1229_v48 = vadd.f32 %v1228_v47, %v1185_v29  ;;  %v1420_v29 = vld.sshfl [vmem:[#allocation1 + $0x8] sm:$0xff pattern:$0x75316420] }
 0x4c9   : > { %1427 = vst [vmem:[#allocation1] ss:$2 sm:$0xff] %v1425_v45 }
 0x4ca   : > { %v1249_v49 = vadd.f32 %v1248_v46, %v1229_v48 }
 0x4cc   : > { %v1297_v54 = vadd.f32 %v1295_v53, %v1249_v49  ;;  %v1205_v40 = vpop.f32.mrf.mxu1 }
 0x4ce   : > { %v1299_v55 = vmax.f32 %v1297_v54, 0.0 }
 0x4d0   : > { %1327 = vmatpush.msrb.mxu3 %v1299_v55  ;;  %v1428_v49 = vld.sshfl [vmem:[#allocation1] sm:$0xff pattern:$0x75316420] }
 0x4d1   : > { %1663 = vmatmul.msk.f32.vlgmr.msrb.gmra.mxu3 %vm1308_vm3, %v1301_v56 }
 0x4d4   : > { %v1288_v33 = vpop.f32.mrf.mxu1 }
 0x4dc   : > { %v1268_v59 = vpop.f32.mrf.mxu0 }
 0x4dd   : > { %v1269_v61 = vadd.f32 %v1268_v59, %v1205_v40 }
 0x4df   : > { %v1289_v62 = vadd.f32 %v1288_v33, %v1269_v61 }
 0x4e1   : > { %v1298_v58 = vadd.f32 %v1295_v53, %v1289_v62  ;;  %v1429_v53 = vld.sshfl [vmem:[#allocation1 + $0x8] sm:$0xff pattern:$0x75316420] }
 0x4e3   : > { %v1300_v63 = vmax.f32 %v1298_v58, 0.0 }
 0x4e5   : > { %1347 = vmatpush.msrb.mxu1 %v1300_v63 }
 0x4e6   : > { %1664 = vmatmul.msk.f32.vlgmr.msrb.gmra.mxu1 %vm1308_vm3, %v1301_v56 }
 0x554   : > { %v1329_v0 = vpop.f32.mrf.mxu3 }
 0x555   : > { %v1330_v1 = vadd.f32 %v1329_v0, %v1306_v57 }
 0x557   : > { %v1353_v4 = vsel %vm1352_vm4, %v1330_v1, 0.0 }
 0x563   : > { %v1349_v2 = vpop.f32.mrf.mxu1 }
 0x564   : > { %v1350_v3 = vadd.f32 %v1349_v2, %v1306_v57 }
 0x566   : > { %v1354_v5 = vsel %vm1352_vm4, %v1350_v3, 0.0 }
 0x567   : > { %v1355_v6 = vadd.f32 %v1354_v5, %v1353_v4 }
 0x569   : > { %1356 = vadd.xlane.f32.xlu2 %v1355_v6 }
 0x5dc   : > { %v1357_v11 = vpop.xlane.xlu2 %1356 }
 0x5dd   : > { %v1358_v12 = vrot.slane %v1357_v11, 4 }
 0x5df   : > { %v1359_v13 = vadd.f32 %v1358_v12, %v1357_v11 }
 0x5e1   : > { %v1360_v14 = vrot.slane %v1359_v13, 2 }
 0x5e3   : > { %v1361_v23 = vadd.f32 %v1360_v14, %v1359_v13 }
 0x5e5   : > { %v1362_v16 = vrot.slane %v1361_v23, 1 }
 0x5e7   : > { %v1363_v17 = vadd.f32 %v1362_v16, %v1361_v23 }
 0x5e9   : > { %1669 = vpush %v1363_v17 }
 0x5ea   : > { %1671 = vpush %v1371_v18 }
 0x61a   : > { %s1670_s22 = spop %1669 }
 0x61b   : > { %s1672_s23 = spop %1671 }
 0x61c   : > { %s1373_s30 = smul.f32 %s1672_s23, %s1670_s22 }
 0x61e   : > { %v1374_v38 = vstv %s1373_s30 }
 0x61f   : > { %v1375_v20 = vsub.f32 %v1330_v1, %v1374_v38  ;;  %v1376_v52 = vsub.f32 %v1350_v3, %v1374_v38 }
 0x621   : > { %v1377_v25 = vmul.f32 %v1375_v20, %v1375_v20  ;;  %v1378_v21 = vmul.f32 %v1376_v52, %v1376_v52 }
 0x623   : > { %v1379_v22 = vsel %vm1352_vm4, %v1377_v25, 0.0  ;;  %v1380_v24 = vsel %vm1352_vm4, %v1378_v21, 0.0 }
 0x624   : > { %v1381_v27 = vadd.f32 %v1380_v24, %v1379_v22 }
 0x626   : > { %1382 = vadd.xlane.f32.xlu0 %v1381_v27 }
 0x699   : > { %v1383_v41 = vpop.xlane.xlu0 %1382 }
 0x69a   : > { %v1384_v28 = vrot.slane %v1383_v41, 4 }
 0x69c   : > { %v1385_v31 = vadd.f32 %v1384_v28, %v1383_v41 }
 0x69e   : > { %v1386_v34 = vrot.slane %v1385_v31, 2 }
 0x6a0   : > { %v1387_v35 = vadd.f32 %v1386_v34, %v1385_v31 }
 0x6a2   : > { %v1388_v51 = vrot.slane %v1387_v35, 1 }
 0x6a4   : > { %v1389_v32 = vadd.f32 %v1388_v51, %v1387_v35 }
 0x6a6   : > { %1673 = vpush %v1389_v32 }
 0x6d7   : > { %s1674_s14 = spop %1673 }
 0x6d8   : > { %s1399_s26 = smul.f32 %s1674_s14, %s1672_s23 }
 0x6da   : > { %s1400_s28 = sadd.f32 1e-05, %s1399_s26 }
 0x6dc   : > { %v1401_v19 = vstv %s1400_s28 }
 0x6dd   : > { %1784 = vrsqrt.f32 %v1401_v19  ;;  %vm1408_vm6 = vweird.f32 %v1401_v19 }
 0x6e3   : > { %v1785_v36 = vpop.eup %1784 }
 0x6e4   : > { %v1403_v37 = vmul.f32 %v1785_v36, %v1401_v19  ;;  %vm1409_vm15 = vweird.f32 %v1785_v36 }
 0x6e5   : > { %vm1410_vm8 = vmor %vm1408_vm6, %vm1409_vm15 }
 0x6e6   : > { %v1404_v39 = vmul.f32 %v1785_v36, %v1403_v37 }
 0x6e8   : > { %v1405_v42 = vmul.f32 0.5, %v1404_v39 }
 0x6ea   : > { %v1406_v43 = vsub.f32 1.5, %v1405_v42 }
 0x6ec   : > { %v1407_v50 = vmul.f32 %v1785_v36, %v1406_v43 }
 0x6ee   : > { %v1411_v44 = vsel %vm1410_vm8, %v1785_v36, %v1407_v50 }
 0x6ef   : > { %1675 = vpush %v1411_v44 }
 0x720   : > { %s1676_s27 = spop %1675 }
 0x721   : > { %v1413_v47 = vstv %s1676_s27 }
 0x722   : > { %v1414_v46 = vmul.f32 %v1413_v47, %v1375_v20  ;;  %v1415_v48 = vmul.f32 %v1413_v47, %v1376_v52 }
 0x724   : > { %v1423_v54 = vmul.f32 %v1419_v30, %v1414_v46  ;;  %v1424_v55 = vmul.f32 %v1420_v29, %v1415_v48 }
 0x726   : > { %v1432_v56 = vadd.f32 %v1428_v49, %v1423_v54  ;;  %v1433_v40 = vadd.f32 %v1429_v53, %v1424_v55 }
 0x728   : > { %v1434_v59 = vsub.f32 0.0, %v1432_v56  ;;  %v1435_v33 = vsub.f32 0.0, %v1433_v40 }
 0x72a   : > { %v1436_v61 = vmul.f32 1.442695, %v1434_v59  ;;  %v1438_v62 = vmul.f32 1.442695, %v1435_v33 }
 0x72c   : > { %1786 = vpow2.f32 %v1436_v61 }
 0x72d   : > { %1788 = vpow2.f32 %v1438_v62 }
 0x732   : > { %v1787_v58 = vpop.eup %1786 }
 0x733   : > { %v1789_v63 = vpop.eup %1788  ;;  %v1440_v0 = vadd.f32 1.0, %v1787_v58 }
 0x734   : > { %v1441_v57 = vadd.f32 1.0, %v1789_v63 }
 0x735   : > { %1790 = vrcp.f32 %v1440_v0  ;;  %vm1447_vm0 = vweird.f32 %v1440_v0  ;;  %v1453_v12 = vand.u32 2147483648, %v1440_v0  ;;  %v1451_v13 = vand.u32 2147483647, %v1440_v0 }
 0x736   : > { %1792 = vrcp.f32 %v1441_v57  ;;  %v1468_v8 = vand.u32 2147483648, %v1441_v57  ;;  %v1466_v10 = vand.u32 2147483647, %v1441_v57  ;;  %vm1462_vm5 = vweird.f32 %v1441_v57 }
 0x737   : > { %v1454_v16 = vor.u32 1.1754944e-38, %v1453_v12  ;;  %vm1452_vm9 = vcmp.eq.f32.partialorder %v1451_v13, 8.507059e+37 }
 0x738   : > { %v1469_v14 = vor.u32 1.1754944e-38, %v1468_v8  ;;  %vm1467_vm13 = vcmp.eq.f32.partialorder %v1466_v10, 8.507059e+37 }
 0x73b   : > { %v1791_v1 = vpop.eup %1790 }
 0x73c   : > { %v1793_v2 = vpop.eup %1792  ;;  %v1443_v3 = vmul.f32 %v1791_v1, %v1440_v0  ;;  %vm1448_vm1 = vweird.f32 %v1791_v1 }
 0x73d   : > { %v1458_v4 = vmul.f32 %v1793_v2, %v1441_v57  ;;  %vm1463_vm2 = vweird.f32 %v1793_v2  ;;  %vm1449_vm7 = vmor %vm1447_vm0, %vm1448_vm1 }
 0x73e   : > { %v1444_v5 = vsub.f32 1.0, %v1443_v3  ;;  %vm1464_vm11 = vmor %vm1462_vm5, %vm1463_vm2 }
 0x73f   : > { %v1459_v6 = vsub.f32 1.0, %v1458_v4 }
 0x740   : > { %v1445_v7 = vmul.f32 %v1791_v1, %v1444_v5 }
 0x741   : > { %v1460_v9 = vmul.f32 %v1793_v2, %v1459_v6 }
 0x742   : > { %v1446_v11 = vadd.f32 %v1791_v1, %v1445_v7 }
 0x743   : > { %v1461_v60 = vadd.f32 %v1793_v2, %v1460_v9 }
 0x744   : > { %v1450_v23 = vsel %vm1449_vm7, %v1791_v1, %v1446_v11 }
 0x745   : > { %v1465_v15 = vsel %vm1464_vm11, %v1793_v2, %v1461_v60  ;;  %v1455_v38 = vsel %vm1452_vm9, %v1454_v16, %v1450_v23 }
 0x746   : > { %v1470_v17 = vsel %vm1467_vm13, %v1469_v14, %v1465_v15 }
 0x747   : > { %v1474_v18 = vrot.slane %v1470_v17, 4 }
 0x749   : > { %v1475_v20 = vsel %vm2634_vm10, %v1455_v38, %v1474_v18 }
 0x74a   : > { %1477 = vst [vmem:[%s472_s18] sm:$0x77] %v1475_v20 }
 0x74b PF: > { %s25_s21 = sadd.s32 1, %s1932_s21  }
 0x74c   : > { %p22_p7 = scmp.ge.s32.totalorder %s25_s21, 4  }
 0x74e   :  { %24 = sbr.rel (!%p22_p7) target bundleno = 3 (0x3), region = 115 }
 0x753   :  { %1499 = vsyncpa [#allocation3], 1 }
 0x754   :  { %1501 = vsyncpa [#allocation3 + $0x1], 1 }
 0x755   :  { %1502 = vsyncpa [#allocation5], 1 }
 0x756   :  { %1503 = vsyncpa [#allocation8], 1 }

</bundles_post_ra>
